<compile_context>
chip_gen: v6e
topology: v6e:2x2x1
jax: 0.10.0
libtpu: 0.0.40
codegen_flags: <defaults>
</compile_context>

<pallas_src>
import functools
import math

import jax
import jax.numpy as jnp
from jax.experimental import pallas as pl
from jax.experimental.pallas import tpu as pltpu


_WEIGHT_ORDER = (
    "qw", "qb", "kvw", "kvb", "ow", "ob",
    "f1w_a", "f1w_s", "f1b", "f2w", "f2b", "hscale", "hmask",
)


def _round_up(x, m):
  return ((x + m - 1) // m) * m


def _temporal_attention_kernel(
    # data blocks (per grid step)
    qsrc_ref,    # (Bb, U+T)    bf16  [src | src_time]
    key_ref,     # (Bb, N, U+I+T) bf16 [nbr | edge | time]
    biasv_ref,   # (Bb, 128)    f32   lanes 0:N = additive bias, lane N = valid flag
    # weights (constant blocks, (in, out) layout)
    qw_ref, qb_ref,                  # (U+T, E) bf16, (1, E) f32
    kvw_ref, kvb_ref,                # (U+I+T, 2E) bf16, (1, 2E) f32
    ow_ref, ob_ref,                  # (E, E) bf16, (1, E) f32
    f1w_a_ref, f1w_s_ref, f1b_ref,   # (E, U), (U, U) bf16, (1, U) f32
    f2w_ref, f2b_ref,                # (U, O) bf16, (1, O) f32
    hscale_ref, hmask_ref,           # (H, E) f32 (head lane-select; hscale incl. 1/sqrt(Hd))
    # output
    out_ref,     # (Bb, PACK) f32  packed [merger_out | avg_attn_weights | zeros]
    *, num_heads, users_dim):
  f32 = jnp.float32
  bf16 = jnp.bfloat16

  Bb = qsrc_ref.shape[0]
  N = key_ref.shape[1]
  E = qw_ref.shape[1]
  U = users_dim
  H = num_heads
  O = f2w_ref.shape[1]
  PACK = out_ref.shape[1]

  dn2 = (((1,), (0,)), ((), ()))   # (Bb, F)    @ (F, G)
  dn3 = (((2,), (0,)), ((), ()))   # (Bb, N, F) @ (F, G)

  qsrc = qsrc_ref[...]                       # (Bb, U+T) bf16
  key = key_ref[...]                         # (Bb, N, U+I+T) bf16
  bias = biasv_ref[:, 0:N]                   # (Bb, N) f32
  valid = biasv_ref[:, N:N + 1]              # (Bb, 1) f32
  hscale = hscale_ref[...]                   # (H, E) f32
  hmask = hmask_ref[...]                     # (H, E) f32

  # ---- fused projections: one Q matmul, one joint K|V matmul (bf16 MXU, f32 acc) ----
  q2 = jax.lax.dot_general(qsrc, qw_ref[...], dn2,
                           preferred_element_type=f32) + qb_ref[...]        # (Bb, E)
  kv3 = jax.lax.dot_general(key, kvw_ref[...], dn3,
                            preferred_element_type=f32) + kvb_ref[...]      # (Bb, N, 2E)
  k3 = kv3[:, :, 0:E]                                                       # (Bb, N, E)
  v3 = kv3[:, :, E:2 * E]                                                   # (Bb, N, E)

  # ---- per-head attention: VPU broadcast-multiplies + XLU reduces, softmax in f32 ----
  p_sum = jnp.zeros((Bb, N), f32)
  attn_pre = jnp.zeros((Bb, E), f32)
  for h in range(H):                                   # H is tiny (2); statically unrolled
    qh = q2 * hscale[h:h + 1, :]                       # (Bb, E)  head lanes, pre-scaled
    s = jnp.sum(qh[:, None, :] * k3, axis=-1) + bias   # (Bb, N)  lane reduce over E
    m = jnp.max(s, axis=-1, keepdims=True)
    p = jnp.exp(s - m)
    denom = jnp.sum(p, axis=-1, keepdims=True)
    p = p * pl.reciprocal(denom, approx=True)          # (Bb, N)
    # TODO(synk): attention dropout (p=0.1) not applied - eval-mode semantics.
    p_sum = p_sum + p
    ctx = jnp.sum(p[:, :, None] * v3, axis=1)          # (Bb, E)  sublane reduce over N
    attn_pre = attn_pre + ctx * hmask[h:h + 1, :]      # keep only this head's lanes
  avg_w = p_sum * (1.0 / H)                            # (Bb, N) averaged attention weights

  # attention output projection, then masked_fill of fully-padded neighborhoods
  attn = jax.lax.dot_general(attn_pre.astype(bf16), ow_ref[...], dn2,
                             preferred_element_type=f32) + ob_ref[...]      # (Bb, E)
  attn = attn * valid
  avg_w = avg_w * valid

  # ---- MergeLayer: relu(fc1([attn, src])) -> fc2, concat-free via split fc1 rows ----
  src_b = qsrc[:, 0:U]                                                      # (Bb, U) bf16
  h1 = (jax.lax.dot_general(attn.astype(bf16), f1w_a_ref[...], dn2,
                            preferred_element_type=f32)
        + jax.lax.dot_general(src_b, f1w_s_ref[...], dn2,
                              preferred_element_type=f32)
        + f1b_ref[...])
  h1 = jnp.maximum(h1, 0.0)
  out = (jax.lax.dot_general(h1.astype(bf16), f2w_ref[...], dn2,
                             preferred_element_type=f32) + f2b_ref[...])    # (Bb, O)

  # ---- single unmasked 128-lane store of the packed output slab ----
  parts = [out, avg_w]
  if PACK > O + N:
    parts.append(jnp.zeros((Bb, PACK - O - N), f32))
  out_ref[...] = jnp.concatenate(parts, axis=-1)


def make_params(key, users_dim, items_dim, time_dim, output_dim, num_heads):
  """Deterministic synthetic parameters (PyTorch layout: weights are (out, in))."""
  del num_heads
  E = users_dim + time_dim               # query_dim / embed_dim
  K = users_dim + time_dim + items_dim   # key_dim / vdim
  U = users_dim
  O = output_dim
  keys = jax.random.split(key, 8)

  def xavier(k, fan_in, fan_out):
    std = math.sqrt(2.0 / (fan_in + fan_out))
    return (std * jax.random.normal(k, (fan_out, fan_in))).astype(jnp.float32)

  return dict(
      q_w=xavier(keys[0], E, E),          # (E, E)
      k_w=xavier(keys[1], K, E),          # (E, K)
      v_w=xavier(keys[2], K, E),          # (E, K)
      q_b=jnp.zeros((E,), jnp.float32),
      k_b=jnp.zeros((E,), jnp.float32),
      v_b=jnp.zeros((E,), jnp.float32),
      o_w=xavier(keys[3], E, E),          # (E, E)
      o_b=jnp.zeros((E,), jnp.float32),
      fc1_w=xavier(keys[4], E + U, U),    # (U, E+U)
      fc1_b=(0.01 * jax.random.normal(keys[5], (U,))).astype(jnp.float32),
      fc2_w=xavier(keys[6], U, O),        # (O, U)
      fc2_b=(0.01 * jax.random.normal(keys[7], (O,))).astype(jnp.float32),
  )


def prepare_kernel_params(params, users_dim, items_dim, time_dim, num_heads):
  """Transpose to (in, out), fuse K|V, split fc1, build head constants, cast bf16. Once."""
  U, I, T = users_dim, items_dim, time_dim
  E = U + T
  H = num_heads
  Hd = E // H
  bf16 = jnp.bfloat16
  f32 = jnp.float32

  kvw = jnp.concatenate([params["k_w"].T, params["v_w"].T], axis=1).astype(bf16)  # (K, 2E)
  kvb = jnp.concatenate([params["k_b"], params["v_b"]])[None, :].astype(f32)      # (1, 2E)
  f1w = params["fc1_w"].T.astype(bf16)                                            # (E+U, U)
  hmask = (jnp.arange(E)[None, :] // Hd == jnp.arange(H)[:, None]).astype(f32)    # (H, E)

  return dict(
      qw=params["q_w"].T.astype(bf16),                 # (E, E)
      qb=params["q_b"][None, :].astype(f32),
      kvw=kvw, kvb=kvb,
      ow=params["o_w"].T.astype(bf16),
      ob=params["o_b"][None, :].astype(f32),
      f1w_a=f1w[:E], f1w_s=f1w[E:E + U],
      f1b=params["fc1_b"][None, :].astype(f32),
      f2w=params["fc2_w"].T.astype(bf16),
      f2b=params["fc2_b"][None, :].astype(f32),
      hscale=hmask * (1.0 / math.sqrt(Hd)),
      hmask=hmask,
  )


def temporal_attention_forward(kparams, src_feats, src_time_feats, nbr_feats,
                               nbr_time_feats, nbr_edge_feats, padding_mask,
                               *, num_heads, block_b=None):
  """JAX glue (mask prep, input fusion, batch padding) + one gridded Pallas kernel."""
  B, U = src_feats.shape
  N = nbr_feats.shape[1]
  I = nbr_edge_feats.shape[2]
  T = nbr_time_feats.shape[2]
  QD = U + T
  KD = U + I + T
  E = kparams["qw"].shape[1]
  O = kparams["f2w"].shape[1]
  PACK = _round_up(O + N, 128)
  BPACK = _round_up(N + 1, 128)
  bf16 = jnp.bfloat16

  # ---- exact boolean fully-padded-row handling (PyTorch un-masks neighbor 0) ----
  mask = padding_mask.astype(bool)                              # True = padded
  invalid = jnp.all(mask, axis=1, keepdims=True)                # (B, 1)
  col0 = (jnp.arange(N) == 0)[None, :]
  eff_mask = mask & ~(invalid & col0)
  bias = jnp.where(eff_mask, -1e30, 0.0).astype(jnp.float32)    # (B, N)
  valid = (~invalid).astype(jnp.float32)                        # (B, 1)
  biasv = jnp.zeros((B, BPACK), jnp.float32)
  biasv = biasv.at[:, 0:N].set(bias).at[:, N:N + 1].set(valid)  # one packed f32 stream

  # ---- fused inputs: one query-side block, one key-side block ----
  qsrc = jnp.concatenate([src_feats, src_time_feats[:, 0, :]], axis=1).astype(bf16)  # (B, QD)
  key = jnp.concatenate([nbr_feats, nbr_edge_feats, nbr_time_feats],
                        axis=2).astype(bf16)                                         # (B, N, KD)

  # ---- per-generation block size / VMEM budget ----
  try:
    vmem_cap = int(pltpu.get_tpu_info().vmem_capacity_bytes)
  except Exception:  # pragma: no cover - conservative fallback
    vmem_cap = 128 * 1024 * 1024
  if block_b is None:
    block_b = 2048 if vmem_cap >= (100 << 20) else 1024   # v5e/v6e : v7x

  B8 = _round_up(B, 8)
  Bb = min(_round_up(block_b, 8), B8)
  if Bb == B8 and B8 >= 16:
    Bb = _round_up(B8 // 2, 8)        # keep >= 2 grid steps so both v7x TCs get work
  B_pad = _round_up(B8, Bb)

  def pad_b(x):
    if x.shape[0] == B_pad:
      return x
    return jnp.pad(x, [(0, B_pad - x.shape[0])] + [(0, 0)] * (x.ndim - 1))

  qsrc_p = pad_b(qsrc)
  key_p = pad_b(key)
  biasv_p = pad_b(biasv)

  weights = [kparams[name] for name in _WEIGHT_ORDER]

  data_specs = [
      pl.BlockSpec((Bb, QD), lambda i: (i, 0)),
      pl.BlockSpec((Bb, N, KD), lambda i: (i, 0, 0)),
      pl.BlockSpec((Bb, BPACK), lambda i: (i, 0)),
  ]
  weight_specs = [pl.BlockSpec(w.shape, lambda i: (0, 0)) for w in weights]
  out_spec = pl.BlockSpec((Bb, PACK), lambda i: (i, 0))

  # rough per-step VMEM: double-buffered streamed blocks + f32 intermediates + weights
  row_in = QD * 2 + N * KD * 2 + BPACK * 4 + PACK * 4
  row_interm = (N * 2 * E + 2 * N * E + 6 * E + 6 * N + PACK) * 4
  vmem_est = (2 * Bb * row_in + Bb * row_interm
              + sum(int(w.size) * w.dtype.itemsize for w in weights))
  vmem_limit = int(min(max(2 * vmem_est, 32 << 20), int(0.6 * vmem_cap), 96 << 20))

  slab = pl.pallas_call(
      functools.partial(_temporal_attention_kernel,
                        num_heads=num_heads, users_dim=U),
      out_shape=jax.ShapeDtypeStruct((B_pad, PACK), jnp.float32),
      grid=(B_pad // Bb,),
      in_specs=data_specs + weight_specs,
      out_specs=out_spec,
      compiler_params=pltpu.CompilerParams(
          dimension_semantics=("parallel",),
          vmem_limit_bytes=vmem_limit),
  )(qsrc_p, key_p, biasv_p, *weights)

  out = slab[:B, :O]
  attw = slab[:B, O:O + N]
  return out, attw


def _reference_forward(params, src_feats, src_time_feats, nbr_feats,
                       nbr_time_feats, nbr_edge_feats, padding_mask, *, num_heads):
  """Pure-JAX f32 reference mirroring the PyTorch module (eval mode)."""
  B, _ = src_feats.shape
  N = nbr_feats.shape[1]
  E = params["q_w"].shape[0]
  H = num_heads
  Hd = E // H
  query = jnp.concatenate([src_feats, src_time_feats[:, 0, :]], axis=1)
  key = jnp.concatenate([nbr_feats, nbr_edge_feats, nbr_time_feats], axis=2)
  mask = padding_mask.astype(bool)
  invalid = jnp.all(mask, axis=1, keepdims=True)
  col0 = (jnp.arange(N) == 0)[None, :]
  eff = mask & ~(invalid & col0)
  q = query @ params["q_w"].T + params["q_b"]
  k = jnp.einsum('bnk,ek->bne', key, params["k_w"]) + params["k_b"]
  v = jnp.einsum('bnk,ek->bne', key, params["v_w"]) + params["v_b"]
  q = q * (1.0 / math.sqrt(Hd))
  qh = q.reshape(B, H, Hd)
  kh = k.reshape(B, N, H, Hd)
  vh = v.reshape(B, N, H, Hd)
  s = jnp.einsum('bhd,bnhd->bhn', qh, kh)
  s = jnp.where(eff[:, None, :], -1e30, s)
  p = jax.nn.softmax(s, axis=-1)
  attn = jnp.einsum('bhn,bnhd->bhd', p, vh).reshape(B, E)
  attn = attn @ params["o_w"].T + params["o_b"]
  attw = p.mean(axis=1)
  attn = jnp.where(invalid, 0.0, attn)
  attw = jnp.where(invalid, 0.0, attw)
  h1 = jax.nn.relu(jnp.concatenate([attn, src_feats], axis=1)
                   @ params["fc1_w"].T + params["fc1_b"])
  out = h1 @ params["fc2_w"].T + params["fc2_b"]
  return out, attw


if __name__ == "__main__":
  B, N = 4, 8
  users_dim, items_dim, time_dim = 16, 16, 16
  output_dim = 16
  num_heads = 2

  root = jax.random.PRNGKey(0)
  kp, k1, k2, k3, k4, k5, k6 = jax.random.split(root, 7)

  params = make_params(kp, users_dim, items_dim, time_dim, output_dim, num_heads)
  kparams = prepare_kernel_params(params, users_dim, items_dim, time_dim, num_heads)

  src_feats = jax.random.normal(k1, (B, users_dim), jnp.float32)
  src_time_feats = jax.random.normal(k2, (B, 1, time_dim), jnp.float32)
  nbr_feats = jax.random.normal(k3, (B, N, users_dim), jnp.float32)
  nbr_time_feats = jax.random.normal(k4, (B, N, time_dim), jnp.float32)
  nbr_edge_feats = jax.random.normal(k5, (B, N, items_dim), jnp.float32)

  padding_mask = jax.random.bernoulli(k6, 0.3, (B, N))
  padding_mask = padding_mask.at[1, :].set(True)   # one fully-padded row

  out, attw = temporal_attention_forward(
      kparams, src_feats, src_time_feats, nbr_feats,
      nbr_time_feats, nbr_edge_feats, padding_mask, num_heads=num_heads)
  out = jax.block_until_ready(out)
  attw = jax.block_until_ready(attw)

  ref_out, ref_attw = _reference_forward(
      params, src_feats, src_time_feats, nbr_feats,
      nbr_time_feats, nbr_edge_feats, padding_mask, num_heads=num_heads)

  assert out.shape == (B, output_dim)
  assert attw.shape == (B, N)
  assert bool(jnp.all(jnp.isfinite(out)))
  assert bool(jnp.all(jnp.isfinite(attw)))
  assert bool(jnp.all(attw[1] == 0.0))   # fully-padded row => zeroed attention weights
  # bf16 MXU operands + approx reciprocal => compare against f32 reference loosely
  assert bool(jnp.allclose(out, ref_out, atol=3e-1, rtol=2e-1))
  assert bool(jnp.allclose(attw, ref_attw, atol=5e-2, rtol=2e-1))
  print("KERNEL_OK")
</pallas_src>

<mosaic_0001>
module attributes {stable_mosaic.version = 11 : i64} {
  func.func @_temporal_attention_kernel(%arg0: i32, %arg1: memref<8x32xbf16, #tpu.memory_space<vmem>>, %arg2: memref<8x8x48xbf16, #tpu.memory_space<vmem>>, %arg3: memref<8x128xf32, #tpu.memory_space<vmem>>, %arg4: memref<32x32xbf16, #tpu.memory_space<vmem>>, %arg5: memref<1x32xf32, #tpu.memory_space<vmem>>, %arg6: memref<48x64xbf16, #tpu.memory_space<vmem>>, %arg7: memref<1x64xf32, #tpu.memory_space<vmem>>, %arg8: memref<32x32xbf16, #tpu.memory_space<vmem>>, %arg9: memref<1x32xf32, #tpu.memory_space<vmem>>, %arg10: memref<32x16xbf16, #tpu.memory_space<vmem>>, %arg11: memref<16x16xbf16, #tpu.memory_space<vmem>>, %arg12: memref<1x16xf32, #tpu.memory_space<vmem>>, %arg13: memref<16x16xbf16, #tpu.memory_space<vmem>>, %arg14: memref<1x16xf32, #tpu.memory_space<vmem>>, %arg15: memref<2x32xf32, #tpu.memory_space<vmem>>, %arg16: memref<2x32xf32, #tpu.memory_space<vmem>>, %arg17: memref<8x128xf32, #tpu.memory_space<vmem>>) attributes {dimension_semantics = [#tpu.dimension_semantics<parallel>], iteration_bounds = array<i64: 1>, scalar_prefetch = 0 : i64, scratch_operands = 0 : i64, tpu.core_type = #tpu.core_type<tc>, window_params = [{transform_indices = @transform_0, window_bounds = array<i64: 8, 32>}, {transform_indices = @transform_1, window_bounds = array<i64: 8, 8, 48>}, {transform_indices = @transform_2, window_bounds = array<i64: 8, 128>}, {pipeline_mode = #tpu.pipeline_mode<synchronous>, transform_indices = @transform_3, window_bounds = array<i64: 32, 32>}, {pipeline_mode = #tpu.pipeline_mode<synchronous>, transform_indices = @transform_4, window_bounds = array<i64: 1, 32>}, {pipeline_mode = #tpu.pipeline_mode<synchronous>, transform_indices = @transform_5, window_bounds = array<i64: 48, 64>}, {pipeline_mode = #tpu.pipeline_mode<synchronous>, transform_indices = @transform_6, window_bounds = array<i64: 1, 64>}, {pipeline_mode = #tpu.pipeline_mode<synchronous>, transform_indices = @transform_7, window_bounds = array<i64: 32, 32>}, {pipeline_mode = #tpu.pipeline_mode<synchronous>, transform_indices = @transform_8, window_bounds = array<i64: 1, 32>}, {pipeline_mode = #tpu.pipeline_mode<synchronous>, transform_indices = @transform_9, window_bounds = array<i64: 32, 16>}, {pipeline_mode = #tpu.pipeline_mode<synchronous>, transform_indices = @transform_10, window_bounds = array<i64: 16, 16>}, {pipeline_mode = #tpu.pipeline_mode<synchronous>, transform_indices = @transform_11, window_bounds = array<i64: 1, 16>}, {pipeline_mode = #tpu.pipeline_mode<synchronous>, transform_indices = @transform_12, window_bounds = array<i64: 16, 16>}, {pipeline_mode = #tpu.pipeline_mode<synchronous>, transform_indices = @transform_13, window_bounds = array<i64: 1, 16>}, {pipeline_mode = #tpu.pipeline_mode<synchronous>, transform_indices = @transform_14, window_bounds = array<i64: 2, 32>}, {pipeline_mode = #tpu.pipeline_mode<synchronous>, transform_indices = @transform_15, window_bounds = array<i64: 2, 32>}, {transform_indices = @transform_16, window_bounds = array<i64: 8, 128>}]} {
    %c0 = arith.constant 0 : index
    %c0_0 = arith.constant 0 : index
    %0 = vector.load %arg1[%c0, %c0_0] : memref<8x32xbf16, #tpu.memory_space<vmem>>, vector<8x32xbf16>
    %c0_1 = arith.constant 0 : index
    %c0_2 = arith.constant 0 : index
    %c0_3 = arith.constant 0 : index
    %1 = vector.load %arg2[%c0_1, %c0_2, %c0_3] : memref<8x8x48xbf16, #tpu.memory_space<vmem>>, vector<8x8x48xbf16>
    %c0_4 = arith.constant 0 : index
    %c0_5 = arith.constant 0 : index
    %2 = vector.load %arg3[%c0_4, %c0_5] : memref<8x128xf32, #tpu.memory_space<vmem>>, vector<8x8xf32>
    %c0_6 = arith.constant 0 : index
    %c8 = arith.constant 8 : index
    %3 = vector.load %arg3[%c0_6, %c8] : memref<8x128xf32, #tpu.memory_space<vmem>>, vector<8x1xf32>
    %c0_7 = arith.constant 0 : index
    %c0_8 = arith.constant 0 : index
    %4 = vector.load %arg15[%c0_7, %c0_8] : memref<2x32xf32, #tpu.memory_space<vmem>>, vector<2x32xf32>
    %c0_9 = arith.constant 0 : index
    %c0_10 = arith.constant 0 : index
    %5 = vector.load %arg16[%c0_9, %c0_10] : memref<2x32xf32, #tpu.memory_space<vmem>>, vector<2x32xf32>
    %c0_11 = arith.constant 0 : index
    %c0_12 = arith.constant 0 : index
    %6 = vector.load %arg4[%c0_11, %c0_12] : memref<32x32xbf16, #tpu.memory_space<vmem>>, vector<32x32xbf16>
    %cst = arith.constant dense<0.000000e+00> : vector<8x32xf32>
    %7 = tpu.matmul %0, %6, %cst {dimension_numbers = #tpu.dot_dimension_numbers<[1], [0], [0], [1], [0, 0, 1, 1], [], []>} : vector<8x32xbf16>, vector<32x32xbf16>, vector<8x32xf32> -> vector<8x32xf32>
    %c0_13 = arith.constant 0 : index
    %c0_14 = arith.constant 0 : index
    %8 = vector.load %arg5[%c0_13, %c0_14] : memref<1x32xf32, #tpu.memory_space<vmem>>, vector<1x32xf32>
    %9 = vector.broadcast %8 : vector<1x32xf32> to vector<8x32xf32>
    %10 = arith.addf %7, %9 : vector<8x32xf32>
    %c0_15 = arith.constant 0 : index
    %c0_16 = arith.constant 0 : index
    %11 = vector.load %arg6[%c0_15, %c0_16] : memref<48x64xbf16, #tpu.memory_space<vmem>>, vector<48x64xbf16>
    %cst_17 = arith.constant dense<0.000000e+00> : vector<8x8x64xf32>
    %12 = tpu.matmul %1, %11, %cst_17 {dimension_numbers = #tpu.dot_dimension_numbers<[2], [0], [0, 1], [1], [0, 0, 0, 1, 1, 1], [], []>} : vector<8x8x48xbf16>, vector<48x64xbf16>, vector<8x8x64xf32> -> vector<8x8x64xf32>
    %c0_18 = arith.constant 0 : index
    %c0_19 = arith.constant 0 : index
    %13 = vector.load %arg7[%c0_18, %c0_19] : memref<1x64xf32, #tpu.memory_space<vmem>>, vector<1x64xf32>
    %14 = vector.shape_cast %13 : vector<1x64xf32> to vector<1x1x64xf32>
    %15 = vector.broadcast %14 : vector<1x1x64xf32> to vector<8x8x64xf32>
    %16 = arith.addf %12, %15 : vector<8x8x64xf32>
    %17 = vector.extract_strided_slice %16 {offsets = [0, 0, 0], sizes = [8, 8, 32], strides = [1, 1, 1]} : vector<8x8x64xf32> to vector<8x8x32xf32>
    %18 = vector.extract_strided_slice %16 {offsets = [0, 0, 32], sizes = [8, 8, 32], strides = [1, 1, 1]} : vector<8x8x64xf32> to vector<8x8x32xf32>
    %cst_20 = arith.constant 0.000000e+00 : f32
    %19 = vector.broadcast %cst_20 : f32 to vector<8x8xf32>
    %cst_21 = arith.constant 0.000000e+00 : f32
    %20 = vector.broadcast %cst_21 : f32 to vector<8x32xf32>
    %21 = vector.extract_strided_slice %4 {offsets = [0, 0], sizes = [1, 32], strides = [1, 1]} : vector<2x32xf32> to vector<1x32xf32>
    %22 = vector.broadcast %21 : vector<1x32xf32> to vector<8x32xf32>
    %23 = arith.mulf %10, %22 : vector<8x32xf32>
    %24 = vector.shape_cast %23 : vector<8x32xf32> to vector<8x1x32xf32>
    %25 = vector.broadcast %24 : vector<8x1x32xf32> to vector<8x8x32xf32>
    %26 = arith.mulf %25, %17 : vector<8x8x32xf32>
    %cst_22 = arith.constant dense<0.000000e+00> : vector<8x8xf32>
    %27 = vector.multi_reduction <add>, %26, %cst_22 [2] : vector<8x8x32xf32> to vector<8x8xf32>
    %28 = arith.addf %27, %2 : vector<8x8xf32>
    %cst_23 = arith.constant dense<0xFF800000> : vector<8xf32>
    %29 = vector.multi_reduction <maximumf>, %28, %cst_23 [1] : vector<8x8xf32> to vector<8xf32>
    %30 = vector.shape_cast %29 : vector<8xf32> to vector<8x1xf32>
    %31 = vector.broadcast %30 : vector<8x1xf32> to vector<8x8xf32>
    %32 = arith.subf %28, %31 : vector<8x8xf32>
    %33 = math.exp %32 : vector<8x8xf32>
    %cst_24 = arith.constant dense<0.000000e+00> : vector<8xf32>
    %34 = vector.multi_reduction <add>, %33, %cst_24 [1] : vector<8x8xf32> to vector<8xf32>
    %35 = vector.shape_cast %34 : vector<8xf32> to vector<8x1xf32>
    %36 = tpu.reciprocal %35 {approx = true} : vector<8x1xf32> -> vector<8x1xf32>
    %37 = vector.broadcast %36 : vector<8x1xf32> to vector<8x8xf32>
    %38 = arith.mulf %33, %37 : vector<8x8xf32>
    %39 = arith.addf %19, %38 : vector<8x8xf32>
    %40 = vector.shape_cast %38 : vector<8x8xf32> to vector<8x8x1xf32>
    %41 = vector.broadcast %40 : vector<8x8x1xf32> to vector<8x8x32xf32>
    %42 = arith.mulf %41, %18 : vector<8x8x32xf32>
    %cst_25 = arith.constant dense<0.000000e+00> : vector<8x32xf32>
    %43 = vector.multi_reduction <add>, %42, %cst_25 [1] : vector<8x8x32xf32> to vector<8x32xf32>
    %44 = vector.extract_strided_slice %5 {offsets = [0, 0], sizes = [1, 32], strides = [1, 1]} : vector<2x32xf32> to vector<1x32xf32>
    %45 = vector.broadcast %44 : vector<1x32xf32> to vector<8x32xf32>
    %46 = arith.mulf %43, %45 : vector<8x32xf32>
    %47 = arith.addf %20, %46 : vector<8x32xf32>
    %48 = vector.extract_strided_slice %4 {offsets = [1, 0], sizes = [1, 32], strides = [1, 1]} : vector<2x32xf32> to vector<1x32xf32>
    %49 = vector.broadcast %48 : vector<1x32xf32> to vector<8x32xf32>
    %50 = arith.mulf %10, %49 : vector<8x32xf32>
    %51 = vector.shape_cast %50 : vector<8x32xf32> to vector<8x1x32xf32>
    %52 = vector.broadcast %51 : vector<8x1x32xf32> to vector<8x8x32xf32>
    %53 = arith.mulf %52, %17 : vector<8x8x32xf32>
    %cst_26 = arith.constant dense<0.000000e+00> : vector<8x8xf32>
    %54 = vector.multi_reduction <add>, %53, %cst_26 [2] : vector<8x8x32xf32> to vector<8x8xf32>
    %55 = arith.addf %54, %2 : vector<8x8xf32>
    %cst_27 = arith.constant dense<0xFF800000> : vector<8xf32>
    %56 = vector.multi_reduction <maximumf>, %55, %cst_27 [1] : vector<8x8xf32> to vector<8xf32>
    %57 = vector.shape_cast %56 : vector<8xf32> to vector<8x1xf32>
    %58 = vector.broadcast %57 : vector<8x1xf32> to vector<8x8xf32>
    %59 = arith.subf %55, %58 : vector<8x8xf32>
    %60 = math.exp %59 : vector<8x8xf32>
    %cst_28 = arith.constant dense<0.000000e+00> : vector<8xf32>
    %61 = vector.multi_reduction <add>, %60, %cst_28 [1] : vector<8x8xf32> to vector<8xf32>
    %62 = vector.shape_cast %61 : vector<8xf32> to vector<8x1xf32>
    %63 = tpu.reciprocal %62 {approx = true} : vector<8x1xf32> -> vector<8x1xf32>
    %64 = vector.broadcast %63 : vector<8x1xf32> to vector<8x8xf32>
    %65 = arith.mulf %60, %64 : vector<8x8xf32>
    %66 = arith.addf %39, %65 : vector<8x8xf32>
    %67 = vector.shape_cast %65 : vector<8x8xf32> to vector<8x8x1xf32>
    %68 = vector.broadcast %67 : vector<8x8x1xf32> to vector<8x8x32xf32>
    %69 = arith.mulf %68, %18 : vector<8x8x32xf32>
    %cst_29 = arith.constant dense<0.000000e+00> : vector<8x32xf32>
    %70 = vector.multi_reduction <add>, %69, %cst_29 [1] : vector<8x8x32xf32> to vector<8x32xf32>
    %71 = vector.extract_strided_slice %5 {offsets = [1, 0], sizes = [1, 32], strides = [1, 1]} : vector<2x32xf32> to vector<1x32xf32>
    %72 = vector.broadcast %71 : vector<1x32xf32> to vector<8x32xf32>
    %73 = arith.mulf %70, %72 : vector<8x32xf32>
    %74 = arith.addf %47, %73 : vector<8x32xf32>
    %cst_30 = arith.constant 5.000000e-01 : f32
    %75 = vector.broadcast %cst_30 : f32 to vector<8x8xf32>
    %76 = arith.mulf %66, %75 : vector<8x8xf32>
    %77 = arith.truncf %74 : vector<8x32xf32> to vector<8x32xbf16>
    %c0_31 = arith.constant 0 : index
    %c0_32 = arith.constant 0 : index
    %78 = vector.load %arg8[%c0_31, %c0_32] : memref<32x32xbf16, #tpu.memory_space<vmem>>, vector<32x32xbf16>
    %cst_33 = arith.constant dense<0.000000e+00> : vector<8x32xf32>
    %79 = tpu.matmul %77, %78, %cst_33 {dimension_numbers = #tpu.dot_dimension_numbers<[1], [0], [0], [1], [0, 0, 1, 1], [], []>} : vector<8x32xbf16>, vector<32x32xbf16>, vector<8x32xf32> -> vector<8x32xf32>
    %c0_34 = arith.constant 0 : index
    %c0_35 = arith.constant 0 : index
    %80 = vector.load %arg9[%c0_34, %c0_35] : memref<1x32xf32, #tpu.memory_space<vmem>>, vector<1x32xf32>
    %81 = vector.broadcast %80 : vector<1x32xf32> to vector<8x32xf32>
    %82 = arith.addf %79, %81 : vector<8x32xf32>
    %83 = vector.broadcast %3 : vector<8x1xf32> to vector<8x32xf32>
    %84 = arith.mulf %82, %83 : vector<8x32xf32>
    %85 = vector.broadcast %3 : vector<8x1xf32> to vector<8x8xf32>
    %86 = arith.mulf %76, %85 : vector<8x8xf32>
    %87 = vector.extract_strided_slice %0 {offsets = [0, 0], sizes = [8, 16], strides = [1, 1]} : vector<8x32xbf16> to vector<8x16xbf16>
    %88 = arith.truncf %84 : vector<8x32xf32> to vector<8x32xbf16>
    %c0_36 = arith.constant 0 : index
    %c0_37 = arith.constant 0 : index
    %89 = vector.load %arg10[%c0_36, %c0_37] : memref<32x16xbf16, #tpu.memory_space<vmem>>, vector<32x16xbf16>
    %cst_38 = arith.constant dense<0.000000e+00> : vector<8x16xf32>
    %90 = tpu.matmul %88, %89, %cst_38 {dimension_numbers = #tpu.dot_dimension_numbers<[1], [0], [0], [1], [0, 0, 1, 1], [], []>} : vector<8x32xbf16>, vector<32x16xbf16>, vector<8x16xf32> -> vector<8x16xf32>
    %c0_39 = arith.constant 0 : index
    %c0_40 = arith.constant 0 : index
    %91 = vector.load %arg11[%c0_39, %c0_40] : memref<16x16xbf16, #tpu.memory_space<vmem>>, vector<16x16xbf16>
    %cst_41 = arith.constant dense<0.000000e+00> : vector<8x16xf32>
    %92 = tpu.matmul %87, %91, %cst_41 {dimension_numbers = #tpu.dot_dimension_numbers<[1], [0], [0], [1], [0, 0, 1, 1], [], []>} : vector<8x16xbf16>, vector<16x16xbf16>, vector<8x16xf32> -> vector<8x16xf32>
    %93 = arith.addf %90, %92 : vector<8x16xf32>
    %c0_42 = arith.constant 0 : index
    %c0_43 = arith.constant 0 : index
    %94 = vector.load %arg12[%c0_42, %c0_43] : memref<1x16xf32, #tpu.memory_space<vmem>>, vector<1x16xf32>
    %95 = vector.broadcast %94 : vector<1x16xf32> to vector<8x16xf32>
    %96 = arith.addf %93, %95 : vector<8x16xf32>
    %cst_44 = arith.constant 0.000000e+00 : f32
    %97 = vector.broadcast %cst_44 : f32 to vector<8x16xf32>
    %98 = arith.maximumf %96, %97 : vector<8x16xf32>
    %99 = arith.truncf %98 : vector<8x16xf32> to vector<8x16xbf16>
    %c0_45 = arith.constant 0 : index
    %c0_46 = arith.constant 0 : index
    %100 = vector.load %arg13[%c0_45, %c0_46] : memref<16x16xbf16, #tpu.memory_space<vmem>>, vector<16x16xbf16>
    %cst_47 = arith.constant dense<0.000000e+00> : vector<8x16xf32>
    %101 = tpu.matmul %99, %100, %cst_47 {dimension_numbers = #tpu.dot_dimension_numbers<[1], [0], [0], [1], [0, 0, 1, 1], [], []>} : vector<8x16xbf16>, vector<16x16xbf16>, vector<8x16xf32> -> vector<8x16xf32>
    %c0_48 = arith.constant 0 : index
    %c0_49 = arith.constant 0 : index
    %102 = vector.load %arg14[%c0_48, %c0_49] : memref<1x16xf32, #tpu.memory_space<vmem>>, vector<1x16xf32>
    %103 = vector.broadcast %102 : vector<1x16xf32> to vector<8x16xf32>
    %104 = arith.addf %101, %103 : vector<8x16xf32>
    %cst_50 = arith.constant 0.000000e+00 : f32
    %105 = vector.broadcast %cst_50 : f32 to vector<8x104xf32>
    %106 = tpu.concatenate %104, %86, %105 in 1 : vector<8x16xf32>, vector<8x8xf32>, vector<8x104xf32> -> vector<8x128xf32>
    %c0_51 = arith.constant 0 : index
    %c0_52 = arith.constant 0 : index
    %107 = vector.load %arg17[%c0_51, %c0_52] : memref<8x128xf32, #tpu.memory_space<vmem>>, vector<8x128xf32>
    tpu.vector_store %arg17[%c0_51, %c0_52], %106 {strides = array<i32>} : memref<8x128xf32, #tpu.memory_space<vmem>>, vector<8x128xf32>,
    return
  }
  func.func @transform_0(%arg0: i32) -> (i32, i32) {
    %c0_i32 = arith.constant 0 : i32
    %c0_i32_0 = arith.constant 0 : i32
    return %arg0, %c0_i32 : i32, i32
  }
  func.func @transform_1(%arg0: i32) -> (i32, i32, i32) {
    %c0_i32 = arith.constant 0 : i32
    %c0_i32_0 = arith.constant 0 : i32
    %c0_i32_1 = arith.constant 0 : i32
    return %arg0, %c0_i32, %c0_i32_0 : i32, i32, i32
  }
  func.func @transform_2(%arg0: i32) -> (i32, i32) {
    %c0_i32 = arith.constant 0 : i32
    %c0_i32_0 = arith.constant 0 : i32
    return %arg0, %c0_i32 : i32, i32
  }
  func.func @transform_3(%arg0: i32) -> (i32, i32) {
    %c0_i32 = arith.constant 0 : i32
    %c0_i32_0 = arith.constant 0 : i32
    %c0_i32_1 = arith.constant 0 : i32
    return %c0_i32, %c0_i32_0 : i32, i32
  }
  func.func @transform_4(%arg0: i32) -> (i32, i32) {
    %c0_i32 = arith.constant 0 : i32
    %c0_i32_0 = arith.constant 0 : i32
    %c0_i32_1 = arith.constant 0 : i32
    return %c0_i32, %c0_i32_0 : i32, i32
  }
  func.func @transform_5(%arg0: i32) -> (i32, i32) {
    %c0_i32 = arith.constant 0 : i32
    %c0_i32_0 = arith.constant 0 : i32
    %c0_i32_1 = arith.constant 0 : i32
    return %c0_i32, %c0_i32_0 : i32, i32
  }
  func.func @transform_6(%arg0: i32) -> (i32, i32) {
    %c0_i32 = arith.constant 0 : i32
    %c0_i32_0 = arith.constant 0 : i32
    %c0_i32_1 = arith.constant 0 : i32
    return %c0_i32, %c0_i32_0 : i32, i32
  }
  func.func @transform_7(%arg0: i32) -> (i32, i32) {
    %c0_i32 = arith.constant 0 : i32
    %c0_i32_0 = arith.constant 0 : i32
    %c0_i32_1 = arith.constant 0 : i32
    return %c0_i32, %c0_i32_0 : i32, i32
  }
  func.func @transform_8(%arg0: i32) -> (i32, i32) {
    %c0_i32 = arith.constant 0 : i32
    %c0_i32_0 = arith.constant 0 : i32
    %c0_i32_1 = arith.constant 0 : i32
    return %c0_i32, %c0_i32_0 : i32, i32
  }
  func.func @transform_9(%arg0: i32) -> (i32, i32) {
    %c0_i32 = arith.constant 0 : i32
    %c0_i32_0 = arith.constant 0 : i32
    %c0_i32_1 = arith.constant 0 : i32
    return %c0_i32, %c0_i32_0 : i32, i32
  }
  func.func @transform_10(%arg0: i32) -> (i32, i32) {
    %c0_i32 = arith.constant 0 : i32
    %c0_i32_0 = arith.constant 0 : i32
    %c0_i32_1 = arith.constant 0 : i32
    return %c0_i32, %c0_i32_0 : i32, i32
  }
  func.func @transform_11(%arg0: i32) -> (i32, i32) {
    %c0_i32 = arith.constant 0 : i32
    %c0_i32_0 = arith.constant 0 : i32
    %c0_i32_1 = arith.constant 0 : i32
    return %c0_i32, %c0_i32_0 : i32, i32
  }
  func.func @transform_12(%arg0: i32) -> (i32, i32) {
    %c0_i32 = arith.constant 0 : i32
    %c0_i32_0 = arith.constant 0 : i32
    %c0_i32_1 = arith.constant 0 : i32
    return %c0_i32, %c0_i32_0 : i32, i32
  }
  func.func @transform_13(%arg0: i32) -> (i32, i32) {
    %c0_i32 = arith.constant 0 : i32
    %c0_i32_0 = arith.constant 0 : i32
    %c0_i32_1 = arith.constant 0 : i32
    return %c0_i32, %c0_i32_0 : i32, i32
  }
  func.func @transform_14(%arg0: i32) -> (i32, i32) {
    %c0_i32 = arith.constant 0 : i32
    %c0_i32_0 = arith.constant 0 : i32
    %c0_i32_1 = arith.constant 0 : i32
    return %c0_i32, %c0_i32_0 : i32, i32
  }
  func.func @transform_15(%arg0: i32) -> (i32, i32) {
    %c0_i32 = arith.constant 0 : i32
    %c0_i32_0 = arith.constant 0 : i32
    %c0_i32_1 = arith.constant 0 : i32
    return %c0_i32, %c0_i32_0 : i32, i32
  }
  func.func @transform_16(%arg0: i32) -> (i32, i32) {
    %c0_i32 = arith.constant 0 : i32
    %c0_i32_0 = arith.constant 0 : i32
    return %arg0, %c0_i32 : i32, i32
  }
}

</mosaic_0001>

<bundles_post_ra>
// kernel: tpu_custom_call.1
= control target key start
LH: loop header
LB: loop body
LE: loop exit
PB: predicated region body
PF: predicated region fallthrough
CT: control target
= control target key end

     0   :  { %s3103_s0 = inlined_call_operand.hbm [shape: bf16[8,32], index: 0, kind: input, shape index: {}]   ;;  %s3104_s1 = inlined_call_operand.hbm [shape: bf16[8,8,48], index: 1, kind: input, shape index: {}]   ;;  %s3105_s2 = inlined_call_operand.vmem [shape: f32[8,128], index: 2, kind: input, shape index: {}]   ;;  %s3106_s3 = inlined_call_operand.hbm [shape: bf16[32,32], index: 3, kind: input, shape index: {}]   ;;  %s3107_s4 = inlined_call_operand.hbm [shape: f32[1,32], index: 4, kind: input, shape index: {}]   ;;  %s3108_s5 = inlined_call_operand.vmem [shape: bf16[48,64], index: 5, kind: input, shape index: {}]   ;;  %s3109_s6 = inlined_call_operand.hbm [shape: f32[1,64], index: 6, kind: input, shape index: {}]   ;;  %s3110_s7 = inlined_call_operand.hbm [shape: bf16[32,32], index: 7, kind: input, shape index: {}]   ;;  %s3111_s8 = inlined_call_operand.hbm [shape: f32[1,32], index: 8, kind: input, shape index: {}]   ;;  %s3112_s9 = inlined_call_operand.vmem [shape: bf16[32,16], index: 9, kind: input, shape index: {}]   ;;  %s3113_s10 = inlined_call_operand.hbm [shape: bf16[16,16], index: 10, kind: input, shape index: {}]   ;;  %s3114_s11 = inlined_call_operand.hbm [shape: f32[1,16], index: 11, kind: input, shape index: {}]   ;;  %s3115_s12 = inlined_call_operand.hbm [shape: bf16[16,16], index: 12, kind: input, shape index: {}]   ;;  %s3116_s13 = inlined_call_operand.vmem [shape: f32[1,16], index: 13, kind: input, shape index: {}]   ;;  %s3117_s14 = inlined_call_operand.vmem [shape: f32[2,32], index: 14, kind: input, shape index: {}]   ;;  %s3118_s15 = inlined_call_operand.vmem [shape: f32[2,32], index: 15, kind: input, shape index: {}]   ;;  %s3119_s16 = inlined_call_operand.hbm [shape: f32[8,128], index: 16, kind: output, shape index: {}]  }
   0x1   :  { %3120 = sst [smem:[#allocation27_spill]] %s3103_s0 }
   0x2   :  { %21 = vsyncpa [#allocation3], 0 }
   0x3   :  { %22 = vsyncpa [#allocation6], 0 }
   0x4   :  { %23 = vsyncpa [#allocation9], 0 }
   0x5   :  { %24 = vsyncpa [#allocation12], 0 }
   0x6   :  { %25 = vsyncpa [#allocation15], 0 }
   0x7   :  { %26 = vsyncpa [#allocation18], 0 }
   0x8   :  { %27 = vsyncpa [#allocation4], 0  ;;  %s2390_s21 = smov [#allocation5]  }
   0x9   :  { %s43_s22 = sshll.u32 %s2390_s21, 4  ;;  %s44_s22 = int_to_ptr.vmem [resolvable:$true] %s43_s22 }
   0xa   :  { %s2164_s23 = scalar_lea.vmem %s44_s22, 512  ;;  %p2169_p1 = scmp.lt.s32.totalorder %s44_s22, %s44_s22 }
   0xb   :  { %p2165_p0 = scmp.ne.s32.totalorder %s44_s22, %s2164_s23  ;;  %p2170_p2 = scmp.lt.s32.totalorder %s2164_s23, %s2164_s23 }
   0xd   :  { %p2171_p3 = por %p2170_p2, %p2169_p1 }
   0xf   :  { %p2172_p4 = pnand %p2171_p3, %p2165_p0 }
  0x11   :  { %2175 = shalt.err (!%p2172_p4)
}
  0x12   :  { %s2391_s24 = smov 64   ;;  %s2392_s25 = smov 4  }
  0x13   :  { %49 = dma.hbm_to_vmem [thread:$0]  %s3104_s1, 512, %s44_s22, [#allocation6], %s2391_s24, %s2391_s24, %s2392_s25  }
  0x14   :  { %s2393_s28 = smov [#allocation8]   ;;  %s2394_s30 = smov [#allocation11]  }
  0x15   :  { %s70_s29 = sshll.u32 %s2393_s28, 4  ;;  %s91_s0 = sshll.u32 %s2394_s30, 4  ;;  %s71_s29 = int_to_ptr.vmem [resolvable:$true] %s70_s29  ;;  %s92_s0 = int_to_ptr.vmem [resolvable:$true] %s91_s0 }
  0x16   :  { %s2184_s17 = scalar_lea.vmem %s71_s29, 16  ;;  %s2188_s18 = scalar_lea.vmem %s71_s29, 32 }
  0x17   :  { %p2185_p5 = scmp.ne.s32.totalorder %s71_s29, %s2184_s17  ;;  %p2189_p6 = scmp.lt.s32.totalorder %s71_s29, %s71_s29 }
  0x18   :  { %p2190_p7 = scmp.lt.s32.totalorder %s2188_s18, %s2184_s17 }
  0x1a   :  { %p2191_p8 = por %p2190_p7, %p2189_p6 }
  0x1c   :  { %p2192_p9 = pnand %p2191_p8, %p2185_p5 }
  0x1e   :  { %2195 = shalt.err (!%p2192_p9)
}
  0x1f   :  { %73 = dma.hbm_to_vmem [thread:$0]  %s3107_s4, 16, %s71_s29, [#allocation9]  }
  0x20   :  { %s2204_s21 = scalar_lea.vmem %s92_s0, 256  ;;  %p2209_p11 = scmp.lt.s32.totalorder %s92_s0, %s92_s0 }
  0x21   :  { %p2205_p10 = scmp.ne.s32.totalorder %s92_s0, %s2204_s21  ;;  %p2210_p12 = scmp.lt.s32.totalorder %s2204_s21, %s2204_s21 }
  0x23   :  { %p2211_p13 = por %p2210_p12, %p2209_p11 }
  0x25   :  { %p2212_p0 = pnand %p2211_p13, %p2205_p10 }
  0x27   :  { %2215 = shalt.err (!%p2212_p0)
}
  0x28   :  { %97 = dma.hbm_to_vmem [thread:$0]  %s3110_s7, 256, %s92_s0, [#allocation12], %s2391_s24, %s2391_s24, %s2392_s25  }
  0x29   :  { %s2395_s23 = smov [#allocation14]   ;;  %s2396_s27 = smov [#allocation2]  }
  0x2a   :  { %s115_s26 = sshll.u32 %s2395_s23, 4  ;;  %s34_s4 = sshll.u32 %s2396_s27, 4  ;;  %s116_s26 = int_to_ptr.vmem [resolvable:$true] %s115_s26  ;;  %s35_s4 = int_to_ptr.vmem [resolvable:$true] %s34_s4 }
  0x2b   :  { %s2224_s28 = scalar_lea.vmem %s116_s26, 128  ;;  %p2229_p2 = scmp.lt.s32.totalorder %s116_s26, %s116_s26 }
  0x2c   :  { %p2225_p1 = scmp.ne.s32.totalorder %s116_s26, %s2224_s28  ;;  %p2230_p3 = scmp.lt.s32.totalorder %s2224_s28, %s2224_s28 }
  0x2e   :  { %p2231_p4 = por %p2230_p3, %p2229_p2 }
  0x30   :  { %p2232_p5 = pnand %p2231_p4, %p2225_p1 }
  0x32   :  { %2235 = shalt.err (!%p2232_p5)
}
  0x33   :  { %121 = dma.hbm_to_vmem [thread:$0]  %s3113_s10, 128, %s116_s26, [#allocation15], %s2391_s24, %s2391_s24, %s2392_s25  }
  0x34   :  { %s2244_s7 = scalar_lea.vmem %s35_s4, 64  ;;  %p2249_p7 = scmp.lt.s32.totalorder %s35_s4, %s35_s4 }
  0x35   :  { %p2245_p6 = scmp.ne.s32.totalorder %s35_s4, %s2244_s7  ;;  %p2250_p8 = scmp.lt.s32.totalorder %s2244_s7, %s2244_s7 }
  0x37   :  { %p2251_p9 = por %p2250_p8, %p2249_p7 }
  0x39   :  { %p2252_p10 = pnand %p2251_p9, %p2245_p6 }
  0x3b   :  { %2255 = shalt.err (!%p2252_p10)
}
  0x3c   :  { %s3121_s18 = sld [smem:[#allocation27_spill]]  ;;  %s2397_s19 = smov [#allocation7]  }
  0x3d   :  { %s57_s20 = sshll.u32 %s2397_s19, 4  ;;  %s2398_s21 = smov [#allocation10]   ;;  %s58_s20 = int_to_ptr.vmem [resolvable:$true] %s57_s20 }
  0x3e   :  { %s82_s1 = sshll.u32 %s2398_s21, 4  ;;  %s2264_s22 = scalar_lea.vmem %s58_s20, 256  ;;  %s83_s1 = int_to_ptr.vmem [resolvable:$true] %s82_s1 }
  0x3f   :  { %p2265_p11 = scmp.ne.s32.totalorder %s58_s20, %s2264_s22  ;;  %p2269_p12 = scmp.lt.s32.totalorder %s58_s20, %s58_s20 }
  0x40   :  { %p2270_p13 = scmp.lt.s32.totalorder %s2264_s22, %s2264_s22 }
  0x42   :  { %37 = dma.hbm_to_vmem [thread:$0]  %s3121_s18, 64, %s35_s4, [#allocation3]  }
  0x43   :  { %p2271_p0 = por %p2270_p13, %p2269_p12 }
  0x45   :  { %p2272_p1 = pnand %p2271_p0, %p2265_p11 }
  0x47   :  { %2275 = shalt.err (!%p2272_p1)
}
  0x48   :  { %63 = dma.hbm_to_vmem [thread:$0]  %s3106_s3, 256, %s58_s20, [#allocation6], %s2391_s24, %s2391_s24, %s2392_s25  }
  0x49   :  { %s2284_s26 = scalar_lea.vmem %s83_s1, 16  ;;  %s2288_s27 = scalar_lea.vmem %s83_s1, 32 }
  0x4a   :  { %p2285_p2 = scmp.ne.s32.totalorder %s83_s1, %s2284_s26  ;;  %p2289_p3 = scmp.lt.s32.totalorder %s83_s1, %s83_s1 }
  0x4b   :  { %p2290_p4 = scmp.lt.s32.totalorder %s2288_s27, %s2284_s26 }
  0x4d   :  { %p2291_p5 = por %p2290_p4, %p2289_p3 }
  0x4f   :  { %p2292_p6 = pnand %p2291_p5, %p2285_p2 }
  0x51   :  { %2295 = shalt.err (!%p2292_p6)
}
  0x52   :  { %85 = dma.hbm_to_vmem [thread:$0]  %s3109_s6, 16, %s83_s1, [#allocation9]  }
  0x53   :  { %s2399_s29 = smov [#allocation13]   ;;  %s2400_s7 = smov [#allocation16]  }
  0x54   :  { %s104_s30 = sshll.u32 %s2399_s29, 4  ;;  %s128_s0 = sshll.u32 %s2400_s7, 4  ;;  %s105_s30 = int_to_ptr.vmem [resolvable:$true] %s104_s30  ;;  %s129_s0 = int_to_ptr.vmem [resolvable:$true] %s128_s0 }
  0x55   :  { %s2304_s17 = scalar_lea.vmem %s105_s30, 16  ;;  %s2308_s3 = scalar_lea.vmem %s105_s30, 32 }
  0x56   :  { %p2305_p7 = scmp.ne.s32.totalorder %s105_s30, %s2304_s17  ;;  %p2309_p8 = scmp.lt.s32.totalorder %s105_s30, %s105_s30 }
  0x57   :  { %p2310_p9 = scmp.lt.s32.totalorder %s2308_s3, %s2304_s17 }
  0x59   :  { %p2311_p10 = por %p2310_p9, %p2309_p8 }
  0x5b   :  { %p2312_p11 = pnand %p2311_p10, %p2305_p7 }
  0x5d   :  { %2315 = shalt.err (!%p2312_p11)
}
  0x5e   :  { %107 = dma.hbm_to_vmem [thread:$0]  %s3111_s8, 16, %s105_s30, [#allocation12]  }
  0x5f   :  { %s2324_s20 = scalar_lea.vmem %s129_s0, 16  ;;  %s2328_s6 = scalar_lea.vmem %s129_s0, 32 }
  0x60   :  { %p2325_p12 = scmp.ne.s32.totalorder %s129_s0, %s2324_s20  ;;  %p2329_p13 = scmp.lt.s32.totalorder %s129_s0, %s129_s0 }
  0x61   :  { %p2330_p0 = scmp.lt.s32.totalorder %s2328_s6, %s2324_s20 }
  0x63   :  { %p2331_p1 = por %p2330_p0, %p2329_p13 }
  0x65   :  { %p2332_p2 = pnand %p2331_p1, %p2325_p12 }
  0x67   :  { %2335 = shalt.err (!%p2332_p2)
}
  0x68   :  { %131 = dma.hbm_to_vmem [thread:$0]  %s3114_s11, 16, %s129_s0, [#allocation15]  }
  0x69   :  { %s2401_s22 = smov [#allocation17]  }
  0x6a   :  { %s137_s10 = sshll.u32 %s2401_s22, 4  ;;  %s138_s10 = int_to_ptr.vmem [resolvable:$true] %s137_s10 }
  0x6b   :  { %s2344_s23 = scalar_lea.vmem %s138_s10, 128  ;;  %p2349_p4 = scmp.lt.s32.totalorder %s138_s10, %s138_s10 }
  0x6c   :  { %p2345_p3 = scmp.ne.s32.totalorder %s138_s10, %s2344_s23  ;;  %p2350_p5 = scmp.lt.s32.totalorder %s2344_s23, %s2344_s23 }
  0x6e   :  { %p2351_p6 = por %p2350_p5, %p2349_p4 }
  0x70   :  { %p2352_p7 = pnand %p2351_p6, %p2345_p3 }
  0x72   :  { %2355 = shalt.err (!%p2352_p7)
}
  0x73   :  { %143 = dma.hbm_to_vmem [thread:$0]  %s3115_s12, 128, %s138_s10, [#allocation18], %s2391_s24, %s2391_s24, %s2392_s25  }
  0x74   :  { %2376 = dma.done.wait [#allocation3], 64  }
  0x75   :  { %2377 = vsyncadd [#allocation3], 4294967232 }
  0x76   :  { %2378 = dma.done.wait [#allocation6], 768  }
  0x77   :  { %2379 = vsyncadd [#allocation6], 4294966528 }
  0x78   :  { %2380 = dma.done.wait [#allocation9], 32  }
  0x79   :  { %2381 = vsyncadd [#allocation9], 4294967264 }
  0x7a   :  { %2382 = dma.done.wait [#allocation12], 272  }
  0x7b   :  { %2383 = vsyncadd [#allocation12], 4294967024 }
  0x7c   :  { %2384 = dma.done.wait [#allocation15], 144  }
  0x7d   :  { %2385 = vsyncadd [#allocation15], 4294967152 }
  0x7e   :  { %2386 = dma.done.wait [#allocation18], 128  }
  0x7f   :  { %2387 = vsyncadd [#allocation18], 4294967168  ;;  %v2402_v0 = vmov 0.0   ;;  %vm2403_vm0 = vmmov 0   ;;  %v389_v1 = vlaneseq  ;;  %v2104_v2 = vld [vmem:[#allocation7 + $0x8] sm:$0xff]   ;;  %v2106_v4 = vld [vmem:[#allocation7] sm:$0xff]  }
  0x80   :  { %2030 = vmatprep.subr.bf16.mxu0 %v2402_v0  ;;  %2034 = vmatprep.mubr.msk.bf16.mxu0 %vm2403_vm0, %v2402_v0  ;;  %v2105_v3 = vld [vmem:[%s3108_s5 + $0x10] sm:$0xff]   ;;  %v2107_v6 = vld [vmem:[%s3108_s5 + $0x8] sm:$0xff]   ;;  %vm216_vm1 = vcmask 261120   ;;  %v181_v7 = vld [vmem:[#allocation2] sm:$0xf]  ;;  %vm311_vm2 = vcmask 392192  }
  0x81   :  { %2031 = vmatpush3.bf16.msra.mxu0 %v2104_v2  ;;  %v2547_v5 = vshrl.u32 %v389_v1, 7  ;;  %2038 = vmatprep.subr.bf16.mxu1 %v2105_v3  ;;  %v2108_v8 = vld [vmem:[%s3108_s5] sm:$0xff]   ;;  %v2110_v15 = vld [vmem:[#allocation5 + $0x8] sm:$0xff]   ;;  %v2111_v19 = vld [vmem:[#allocation5 + $0x10] sm:$0xff]   ;;  %v2404_v26 = vmov 1966171168  }
  0x82   :  { %2032 = vmatprep.subr.bf16.mxu0 %v2402_v0  ;;  %2039 = vmatpush3.bf16.msra.mxu1 %v2105_v3  ;;  %v2109_v9 = vld [vmem:[#allocation5] sm:$0xff]   ;;  %v2112_v24 = vld [vmem:[#allocation5 + $0x18] sm:$0xff]   ;;  %v397_v27 = vunpack.c.l.s4 %v2404_v26  ;;  %v1981_v30 = vld [vmem:[#allocation8] ss:$0 sm:$0xff]  ;;  %vm655_vm3 = vcmask 1041409   ;;  %vm657_vm4 = vcmask 1042434  }
  0x83   :  { %2040 = vmatprep.subr.bf16.mxu1 %v2107_v6  ;;  %v2557_v10 = vsub.s32 1, %v2547_v5  ;;  %v2560_v11 = vsub.s32 0, %v2547_v5  ;;  %2044 = vmatprep.mubr.msk.bf16.mxu1 %vm311_vm2, %v2109_v9  ;;  %v2565_v12 = vsub.s32 2, %v2547_v5  ;;  %v2571_v13 = vld [vmem:[%s3105_s2] sm:$0xff]  ;;  %v2574_v14 = vsub.s32 4, %v2547_v5  ;;  %s2406_s7 = smov 32  }
  0x84   :  { %v2579_v17 = vsub.s32 3, %v2547_v5  ;;  %v2595_v23 = vsub.s32 5, %v2547_v5  ;;  %v191_v28 = vld [vmem:[%s3117_s14] sm:$0x3]  ;;  %v398_v29 = vunpack.c.0.s8 %v397_v27  ;;  %v2612_v44 = vld [vmem:[#allocation10] ss:$0 sm:$0xff] }
  0x85   :  { %2033 = vmatpush3.bf16.msra.mxu0 %v2106_v4  ;;  %v527_v16 = vrot.slane %v2571_v13, %v2557_v10  ;;  %v520_v18 = vrot.slane %v2571_v13, %v2560_v11  ;;  %v534_v20 = vrot.slane %v2571_v13, %v2565_v12  ;;  %v548_v21 = vrot.slane %v2571_v13, %v2574_v14  ;;  %s2409_s20 = smov [#allocation19]  }
  0x86   :  { %2052 = vmatprep.subr.bf16.mxu0 %v2402_v0  ;;  %2041 = vmatpush3.bf16.msra.mxu1 %v2107_v6  ;;  %v541_v22 = vrot.slane %v2571_v13, %v2579_v17  ;;  %v555_v25 = vrot.slane %v2571_v13, %v2595_v23  ;;  %v392_v31 = vrot.slane %v191_v28, %v2560_v11  ;;  %vm659_vm5 = vcmask 1043459   ;;  %s1967_s6 = sshll.u32 %s2409_s20, 4  ;;  %s1968_s6 = int_to_ptr.vmem [resolvable:$true] %s1967_s6 }
  0x87   :  { %2042 = vmatprep.subr.bf16.mxu1 %v2108_v8  ;;  %529 = vbcast.lane.b32.xlu1 %v527_v16, 256  ;;  %v1004_v32 = vrot.slane %v191_v28, %v2557_v10  ;;  %v2608_v35 = vsub.s32 %v398_v29, %v2547_v5  ;;  %vm661_vm6 = vcmask 1044484   ;;  %vm663_vm7 = vcmask 1045509   ;;  %s2356_s21 = scalar_lea.vmem %s1968_s6, 128  ;;  %p2361_p9 = scmp.lt.s32.totalorder %s1968_s6, %s1968_s6 }
  0x88   :  { %2035 = vmatmul.mubr.msk.bf16.vlgmr.msra.gmra.mxu0 %vm216_vm1, %v181_v7  ;;  %522 = vbcast.lane.b32.xlu0 %v520_v18, 256  ;;  %vm665_vm8 = vcmask 1046534   ;;  %vm667_vm9 = vcmask 1047559   ;;  %vm670_vm10 = vcmask 64512   ;;  %vm920_vm11 = vcmask 523520   ;;  %p2357_p8 = scmp.ne.s32.totalorder %s1968_s6, %s2356_s21  ;;  %p2362_p10 = scmp.lt.s32.totalorder %s2356_s21, %s2356_s21 }
  0x89   :  { %2056 = vmatprep.mubr.msk.bf16.mxu0 %vm2403_vm0, %v2402_v0  ;;  %vm1718_vm12 = vcmask 130048   ;;  %vm1958_vm13 = vcmask 195584  }
  0x8a   :  { %2043 = vmatpush3.bf16.msra.mxu1 %v2108_v8  ;;  %p2363_p11 = por %p2362_p10, %p2361_p9 }
  0x8b   :  { %2066 = vmatprep.subr.bf16.mxu1 %v2402_v0  ;;  %536 = vbcast.lane.b32.xlu1 %v534_v20, 256 }
  0x8c   :  { %550 = vbcast.lane.b32.xlu0 %v548_v21, 256  ;;  %p2364_p12 = pnand %p2363_p11, %p2357_p8 }
  0x8d   :  { %2045 = vmatmul.mubr.msk.bf16.vlgmr.msra.gmra.mxu1 %vm311_vm2, %v2110_v15 }
  0x8e   :  { %2048 = vmatprep.mubr.msk.bf16.mxu1 %vm311_vm2, %v2111_v19 }
  0x8f   :  { %543 = vbcast.lane.b32.xlu1 %v541_v22, 256 }
  0x93   :  { %557 = vbcast.lane.b32.xlu1 %v555_v25, 256 }
  0x95   :  { %2049 = vmatmul.mubr.msk.bf16.gmra.mxu1 %vm311_vm2, %v2112_v24 }
  0x96   :  { %2070 = vmatprep.mubr.msk.bf16.mxu1 %vm2403_vm0, %v2402_v0 }
 0x148   :  { %v254_v33 = vpop.f32.mrf.mxu0 }
 0x149   :  { %v255_v34 = vadd.f32 %v1981_v30, %v254_v33 }
 0x14a   :  { %v2036_v36 = vpop.f32.mrf.mxu0 }
 0x14b   :  { %v393_v37 = vmul.f32 %v392_v31, %v255_v34  ;;  %v1005_v38 = vmul.f32 %v1004_v32, %v255_v34 }
 0x14c   :  { %v257_v39 = vpop.f32.mrf.mxu0 }
 0x14d   :  { %v395_v40 = vcombine.high %v393_v37, %v393_v37  ;;  %v402_v41 = vrot.slane %v393_v37, %v2608_v35  ;;  %v1014_v42 = vrot.slane %v1005_v38, %v2608_v35  ;;  %v2046_v43 = vpop.f32.mrf.mxu1  ;;  %v1007_v47 = vcombine.high %v1005_v38, %v1005_v38 }
 0x14e   :  { %v2037_v45 = vpop.f32.mrf.mxu0  ;;  %v2625_v61 = vadd.f32 %v2046_v43, %v2612_v44 }
 0x14f   :  { %v410_v46 = vcombine.high %v402_v41, %v402_v41  ;;  %v1022_v48 = vcombine.high %v1014_v42, %v1014_v42  ;;  %v358_v49 = vpop.f32.mrf.mxu1  ;;  %v1030_v50 = vrot.slane %v1014_v42, %v2608_v35  ;;  %v418_v51 = vrot.slane %v402_v41, %v2608_v35 }
 0x150   :  { %v409_v52 = vrot.slane %v395_v40, %v2608_v35  ;;  %v2618_v53 = vadd.f32 %v2612_v44, %v358_v49  ;;  %v1021_v60 = vrot.slane %v1007_v47, %v2608_v35 }
 0x151   :  { %v1044_v54 = vrot.slane %v1022_v48, %v2608_v35  ;;  %v2047_v55 = vpop.f32.mrf.mxu1  ;;  %v1059_v56 = vrot.slane %v1030_v50, %v2560_v11  ;;  %v447_v57 = vrot.slane %v418_v51, %v2560_v11  ;;  %v1052_v58 = vcombine.high %v1030_v50, %v1030_v50 }
 0x152   :  { %v440_v59 = vcombine.high %v418_v51, %v418_v51  ;;  %v432_v63 = vrot.slane %v410_v46, %v2608_v35  ;;  %v1037_v26 = vrot.slane %v1021_v60, %v2608_v35  ;;  %v425_v31 = vrot.slane %v409_v52, %v2608_v35 }
 0x153   :  { %v1063_v62 = vrot.slane %v1044_v54, %v2560_v11  ;;  %v361_v2 = vpop.f32.mrf.mxu1  ;;  %v1096_v3 = vmul.f32 %v1059_v56, %v2618_v53  ;;  %v484_v4 = vmul.f32 %v447_v57, %v2618_v53  ;;  %v1067_v6 = vrot.slane %v1052_v58, %v2560_v11 }
 0x154   :  { %v455_v7 = vrot.slane %v440_v59, %v2560_v11  ;;  %v2634_v8 = vadd.f32 %v2612_v44, %v361_v2  ;;  %v451_v9 = vrot.slane %v432_v63, %v2560_v11  ;;  %v1054_v15 = vcombine.high %v1044_v54, %v1044_v54 }
 0x155   :  { %v442_v16 = vcombine.high %v432_v63, %v432_v63  ;;  %v1104_v18 = vsel %vm216_vm1, %v1096_v3, 0.0  ;;  %v492_v19 = vsel %vm216_vm1, %v484_v4, 0.0  ;;  %v1098_v20 = vmul.f32 %v1067_v6, %v2625_v61  ;;  %v2050_v27 = vpop.f32.mrf.mxu1 }
 0x156   :  { %v486_v21 = vmul.f32 %v455_v7, %v2625_v61  ;;  %1105 = vadd.xlane.f32.xlu1 %v1104_v18  ;;  %493 = vadd.xlane.f32.xlu0 %v492_v19  ;;  %v1097_v22 = vmul.f32 %v1063_v62, %v2634_v8  ;;  %v485_v24 = vmul.f32 %v451_v9, %v2634_v8  ;;  %v2405_v56 = vmov 0  }
 0x157   :  { %v1071_v25 = vrot.slane %v1054_v15, %v2560_v11  ;;  %v1110_v28 = vsel %vm216_vm1, %v1098_v20, 0.0  ;;  %v459_v30 = vrot.slane %v442_v16, %v2560_v11  ;;  %v2650_v32 = vadd.f32 %v2047_v55, %v2612_v44  ;;  %v374_v41 = vpop.f32.mrf.mxu1  ;;  %2101 = vset.pattern.permute.xlu1 %v2405_v56  ;;  %2100 = vset.pattern.permute.xlu0 %v2405_v56 }
 0x158   :  { %v498_v29 = vsel %vm216_vm1, %v486_v21, 0.0  ;;  %v1053_v33 = vcombine.high %v1037_v26, %v1037_v26  ;;  %v411_v34 = vcombine.high %v409_v52, %v409_v52  ;;  %v1023_v36 = vcombine.high %v1021_v60, %v1021_v60 }
 0x159   :  { %v441_v37 = vcombine.high %v425_v31, %v425_v31  ;;  %v2653_v38 = vadd.f32 %v2050_v27, %v2612_v44  ;;  %v1107_v39 = vsel %vm216_vm1, %v1097_v22, 0.0  ;;  %v1099_v40 = vmul.f32 %v1071_v25, %v2650_v32  ;;  %v2051_v50 = vpop.f32.mrf.mxu1 }
 0x15a   :  { %1111 = vadd.xlane.f32.xlu1 %v1110_v28  ;;  %499 = vadd.xlane.f32.xlu0 %v498_v29  ;;  %v495_v42 = vsel %vm216_vm1, %v485_v24, 0.0  ;;  %v487_v43 = vmul.f32 %v459_v30, %v2650_v32  ;;  %v1083_v45 = vrot.slane %v1053_v33, %v2560_v11  ;;  %v1051_v47 = vrot.slane %v1023_v36, %v2608_v35  ;;  %v530_v33 = vpop.permute.xlu1 %529  ;;  %v523_v36 = vpop.permute.xlu0 %522 }
 0x15b   :  { %v471_v46 = vrot.slane %v441_v37, %v2560_v11  ;;  %v439_v48 = vrot.slane %v411_v34, %v2608_v35  ;;  %v2664_v49 = vadd.f32 %v2612_v44, %v374_v41  ;;  %v1113_v51 = vsel %vm216_vm1, %v1099_v40, 0.0  ;;  %v377_v62 = vpop.f32.mrf.mxu1 }
 0x15c   :  { %v501_v52 = vsel %vm216_vm1, %v487_v43, 0.0  ;;  %v1102_v54 = vmul.f32 %v1083_v45, %v2653_v38  ;;  %v1075_v35 = vrot.slane %v1037_v26, %v2560_v11  ;;  %v463_v57 = vrot.slane %v425_v31, %v2560_v11 }
 0x15d   :  { %v490_v55 = vmul.f32 %v471_v46, %v2653_v38  ;;  %v1055_v58 = vcombine.high %v1051_v47, %v1051_v47  ;;  %v443_v59 = vcombine.high %v439_v48, %v439_v48  ;;  %v2675_v60 = vadd.f32 %v2051_v50, %v2612_v44 }
 0x15e   :  { %1108 = vadd.xlane.f32.xlu1 %v1107_v39  ;;  %496 = vadd.xlane.f32.xlu0 %v495_v42  ;;  %v1122_v63 = vsel %vm216_vm1, %v1102_v54, 0.0  ;;  %v1100_v3 = vmul.f32 %v1075_v35, %v2664_v49  ;;  %v488_v4 = vmul.f32 %v463_v57, %v2664_v49  ;;  %v2684_v9 = vadd.f32 %v2612_v44, %v377_v62  ;;  %v537_v34 = vpop.permute.xlu1 %536  ;;  %v551_v39 = vpop.permute.xlu0 %550 }
 0x15f   :  { %v510_v2 = vsel %vm216_vm1, %v490_v55, 0.0  ;;  %v1087_v6 = vrot.slane %v1055_v58, %v2560_v11  ;;  %v475_v7 = vrot.slane %v443_v59, %v2560_v11  ;;  %v1079_v20 = vrot.slane %v1051_v47, %v2560_v11 }
 0x160   :  { %v1116_v15 = vsel %vm216_vm1, %v1100_v3, 0.0  ;;  %v504_v16 = vsel %vm216_vm1, %v488_v4, 0.0  ;;  %v467_v21 = vrot.slane %v439_v48, %v2560_v11  ;;  %v2699_v28 = vsub.s32 7, %v2547_v5 }
 0x161   :  { %v1103_v18 = vmul.f32 %v1087_v6, %v2675_v60  ;;  %v491_v19 = vmul.f32 %v475_v7, %v2675_v60  ;;  %v1101_v44 = vmul.f32 %v1079_v20, %v2684_v9  ;;  %v2704_v30 = vsub.s32 6, %v2547_v5 }
 0x162   :  { %1114 = vadd.xlane.f32.xlu1 %v1113_v51  ;;  %502 = vadd.xlane.f32.xlu0 %v501_v52  ;;  %v489_v25 = vmul.f32 %v467_v21, %v2684_v9  ;;  %v569_v29 = vrot.slane %v2571_v13, %v2699_v28  ;;  %v544_v37 = vpop.permute.xlu1 %543 }
 0x163   :  { %v1125_v22 = vsel %vm216_vm1, %v1103_v18, 0.0  ;;  %v513_v24 = vsel %vm216_vm1, %v491_v19, 0.0  ;;  %v1119_v26 = vsel %vm216_vm1, %v1101_v44, 0.0  ;;  %v562_v31 = vrot.slane %v2571_v13, %v2704_v30 }
 0x164   :  { %v507_v27 = vsel %vm216_vm1, %v489_v25, 0.0 }
 0x166   :  { %1123 = vadd.xlane.f32.xlu1 %v1122_v63  ;;  %511 = vadd.xlane.f32.xlu0 %v510_v2  ;;  %v558_v40 = vpop.permute.xlu1 %557 }
 0x16a   :  { %1117 = vadd.xlane.f32.xlu1 %v1116_v15  ;;  %505 = vadd.xlane.f32.xlu0 %v504_v16 }
 0x16e   :  { %1126 = vadd.xlane.f32.xlu1 %v1125_v22  ;;  %514 = vadd.xlane.f32.xlu0 %v513_v24 }
 0x172   :  { %1120 = vadd.xlane.f32.xlu1 %v1119_v26  ;;  %508 = vadd.xlane.f32.xlu0 %v507_v27 }
 0x183   :  { %571 = vbcast.lane.b32.xlu1 %v569_v29, 256 }
 0x188   :  { %564 = vbcast.lane.b32.xlu0 %v562_v31, 256 }
 0x1df   :  { %v1106_v41 = vpop.xlane.xlu1 %1105  ;;  %v494_v42 = vpop.xlane.xlu0 %493 }
 0x1e0   :  { %v2708_v43 = vadd.f32 %v1106_v41, %v523_v36  ;;  %v2710_v45 = vadd.f32 %v523_v36, %v494_v42 }
 0x1e2   :  { %1145 = vperm.xlu1 %2101, %v2708_v43   ;;  %598 = vperm.xlu0 %2100, %v2710_v45  }
 0x1e3   :  { %v1112_v46 = vpop.xlane.xlu1 %1111  ;;  %v500_v47 = vpop.xlane.xlu0 %499 }
 0x1e4   :  { %v2714_v48 = vadd.f32 %v1112_v46, %v537_v34  ;;  %v2716_v50 = vadd.f32 %v537_v34, %v500_v47 }
 0x1e6   :  { %604 = vperm.xlu1 %2101, %v2716_v50   ;;  %1151 = vperm.xlu0 %2100, %v2714_v48  }
 0x1e7   :  { %v1109_v51 = vpop.xlane.xlu1 %1108  ;;  %v497_v52 = vpop.xlane.xlu0 %496 }
 0x1e8   :  { %v2720_v54 = vadd.f32 %v1109_v51, %v530_v33  ;;  %v2722_v55 = vadd.f32 %v530_v33, %v497_v52 }
 0x1ea   :  { %601 = vperm.xlu1 %2101, %v2722_v55   ;;  %1148 = vperm.xlu0 %2100, %v2720_v54  }
 0x1eb   :  { %v1115_v35 = vpop.xlane.xlu1 %1114  ;;  %v503_v57 = vpop.xlane.xlu0 %502 }
 0x1ec   :  { %v2726_v58 = vadd.f32 %v1115_v35, %v544_v37  ;;  %v2728_v59 = vadd.f32 %v544_v37, %v503_v57  ;;  %v2757_v37 = vand.u32 127, %v389_v1 }
 0x1ee   :  { %607 = vperm.xlu1 %2101, %v2728_v59   ;;  %1154 = vperm.xlu0 %2100, %v2726_v58   ;;  %v2761_v41 = vsub.s32 %v2757_v37, %v2547_v5 }
 0x1ef   :  { %v512_v62 = vpop.xlane.xlu0 %511  ;;  %v1124_v63 = vpop.xlane.xlu1 %1123 }
 0x1f3   :  { %v506_v2 = vpop.xlane.xlu0 %505  ;;  %v1118_v3 = vpop.xlane.xlu1 %1117 }
 0x1f4   :  { %v2738_v20 = vadd.f32 %v1118_v3, %v551_v39  ;;  %v2740_v21 = vadd.f32 %v551_v39, %v506_v2 }
 0x1f7   :  { %v515_v4 = vpop.xlane.xlu0 %514  ;;  %v1127_v7 = vpop.xlane.xlu1 %1126 }
 0x1fb   :  { %v509_v6 = vpop.xlane.xlu0 %508  ;;  %v1121_v19 = vpop.xlane.xlu1 %1120 }
 0x1fc   :  { %v2744_v22 = vadd.f32 %v1121_v19, %v558_v40  ;;  %v2746_v24 = vadd.f32 %v558_v40, %v509_v6 }
 0x1ff   :  { %v565_v15 = vpop.permute.xlu0 %564  ;;  %v572_v44 = vpop.permute.xlu1 %571 }
 0x200   :  { %v2732_v16 = vadd.f32 %v565_v15, %v512_v62  ;;  %v2734_v18 = vadd.f32 %v1124_v63, %v565_v15  ;;  %v2750_v25 = vadd.f32 %v572_v44, %v515_v4  ;;  %v2752_v26 = vadd.f32 %v1127_v7, %v572_v44 }
 0x202   :  { %616 = vperm.xlu1 %2101, %v2732_v16   ;;  %1163 = vperm.xlu0 %2100, %v2734_v18  }
 0x206   :  { %610 = vperm.xlu1 %2101, %v2740_v21   ;;  %1157 = vperm.xlu0 %2100, %v2738_v20  }
 0x20a   :  { %613 = vperm.xlu1 %2101, %v2746_v24   ;;  %1160 = vperm.xlu0 %2100, %v2744_v22  }
 0x20e   :  { %619 = vperm.xlu1 %2101, %v2750_v25   ;;  %1166 = vperm.xlu0 %2100, %v2752_v26  }
 0x25d   :  { %v1146_v27 = vpop.permute.xlu1 %1145  ;;  %v599_v29 = vpop.permute.xlu0 %598 }
 0x25e   :  { %v1171_v52 = vrot.slane %v1146_v27, %v2761_v41  ;;  %v626_v35 = vrot.slane %v599_v29, %v2761_v41 }
 0x261   :  { %v605_v31 = vpop.permute.xlu1 %604  ;;  %v1152_v33 = vpop.permute.xlu0 %1151 }
 0x262   :  { %v634_v4 = vrot.slane %v605_v31, %v2761_v41  ;;  %v1179_v6 = vrot.slane %v1152_v33, %v2761_v41 }
 0x265   :  { %v602_v34 = vpop.permute.xlu1 %601  ;;  %v1149_v36 = vpop.permute.xlu0 %1148 }
 0x266   :  { %v630_v47 = vrot.slane %v602_v34, %v2761_v41  ;;  %v1175_v51 = vrot.slane %v1149_v36, %v2761_v41 }
 0x268   :  { %v656_v62 = vsel %vm655_vm3, %v630_v47, %v626_v35  ;;  %v1200_v63 = vsel %vm655_vm3, %v1175_v51, %v1171_v52 }
 0x269   :  { %v608_v39 = vpop.permute.xlu1 %607  ;;  %v1155_v40 = vpop.permute.xlu0 %1154  ;;  %v658_v19 = vsel %vm657_vm4, %v634_v4, %v656_v62  ;;  %v1201_v44 = vsel %vm657_vm4, %v1179_v6, %v1200_v63 }
 0x26a   :  { %v638_v2 = vrot.slane %v608_v39, %v2761_v41  ;;  %v1183_v3 = vrot.slane %v1155_v40, %v2761_v41 }
 0x26c   :  { %v660_v34 = vsel %vm659_vm5, %v638_v2, %v658_v19  ;;  %v1202_v36 = vsel %vm659_vm5, %v1183_v3, %v1201_v44 }
 0x27d   :  { %v617_v42 = vpop.permute.xlu1 %616  ;;  %v1164_v46 = vpop.permute.xlu0 %1163 }
 0x27e   :  { %v650_v52 = vrot.slane %v617_v42, %v2761_v41  ;;  %v1195_v35 = vrot.slane %v1164_v46, %v2761_v41 }
 0x281   :  { %v611_v1 = vpop.permute.xlu1 %610  ;;  %v1158_v57 = vpop.permute.xlu0 %1157 }
 0x282   :  { %v642_v7 = vrot.slane %v611_v1, %v2761_v41  ;;  %v1187_v15 = vrot.slane %v1158_v57, %v2761_v41 }
 0x284   :  { %v662_v39 = vsel %vm661_vm6, %v642_v7, %v660_v34  ;;  %v1203_v40 = vsel %vm661_vm6, %v1187_v15, %v1202_v36 }
 0x285   :  { %v614_v27 = vpop.permute.xlu1 %613  ;;  %v1161_v29 = vpop.permute.xlu0 %1160 }
 0x286   :  { %v646_v31 = vrot.slane %v614_v27, %v2761_v41  ;;  %v1191_v33 = vrot.slane %v1161_v29, %v2761_v41 }
 0x288   :  { %v664_v47 = vsel %vm663_vm7, %v646_v31, %v662_v39  ;;  %v1204_v51 = vsel %vm663_vm7, %v1191_v33, %v1203_v40 }
 0x289   :  { %v620_v1 = vpop.permute.xlu1 %619  ;;  %v1167_v57 = vpop.permute.xlu0 %1166  ;;  %v666_v2 = vsel %vm665_vm8, %v650_v52, %v664_v47  ;;  %v1205_v3 = vsel %vm665_vm8, %v1195_v35, %v1204_v51 }
 0x28a   :  { %v654_v62 = vrot.slane %v620_v1, %v2761_v41  ;;  %v1199_v63 = vrot.slane %v1167_v57, %v2761_v41 }
 0x28c   :  { %v668_v4 = vsel %vm667_vm9, %v654_v62, %v666_v2  ;;  %v1206_v6 = vsel %vm667_vm9, %v1199_v63, %v1205_v3 }
 0x28d   :  { %v671_v42 = vsel %vm670_vm10, %v668_v4, -inf  ;;  %v1208_v46 = vsel %vm670_vm10, %v1206_v6, -inf }
 0x28e   :  { %672 = vmax.xlane.f32.xlu1 %v671_v42  ;;  %1209 = vmax.xlane.f32.xlu0 %v1208_v46 }
 0x317   :  { %v2795_v7 = vpop.xlane.xlu1 %672  ;;  %v2801_v44 = vpop.xlane.xlu0 %1209 }
 0x318   :  { %v678_v15 = vrot.slane %v2795_v7, %v2560_v11  ;;  %v682_v19 = vrot.slane %v2795_v7, %v2557_v10  ;;  %v1215_v31 = vrot.slane %v2801_v44, %v2560_v11  ;;  %v1219_v33 = vrot.slane %v2801_v44, %v2557_v10 }
 0x319   :  { %v686_v39 = vrot.slane %v2795_v7, %v2565_v12  ;;  %v1223_v40 = vrot.slane %v2801_v44, %v2565_v12  ;;  %v690_v47 = vrot.slane %v2795_v7, %v2579_v17  ;;  %v1227_v52 = vrot.slane %v2801_v44, %v2579_v17 }
 0x31a   :  { %v715_v27 = vsub.f32 %v2710_v45, %v678_v15  ;;  %v716_v29 = vsub.f32 %v2722_v55, %v682_v19  ;;  %v1252_v45 = vsub.f32 %v2708_v43, %v1215_v31  ;;  %v1253_v55 = vsub.f32 %v2720_v54, %v1219_v33 }
 0x31b   :  { %v717_v51 = vsub.f32 %v2716_v50, %v686_v39  ;;  %v1254_v35 = vsub.f32 %v2714_v48, %v1223_v40  ;;  %v694_v62 = vrot.slane %v2795_v7, %v2574_v14  ;;  %v718_v63 = vsub.f32 %v2728_v59, %v690_v47 }
 0x31c   :  { %v723_v34 = vmul.f32 1.442695, %v715_v27  ;;  %v725_v36 = vmul.f32 1.442695, %v716_v29  ;;  %v1260_v1 = vmul.f32 1.442695, %v1252_v45  ;;  %v1231_v54 = vrot.slane %v2801_v44, %v2574_v14 }
 0x31d   :  { %v1262_v57 = vmul.f32 1.442695, %v1253_v55  ;;  %v727_v43 = vmul.f32 1.442695, %v717_v51  ;;  %v1255_v2 = vsub.f32 %v2726_v58, %v1227_v52  ;;  %v1264_v50 = vmul.f32 1.442695, %v1254_v35 }
 0x31e   :  { %2119 = vpow2.f32 %v723_v34  ;;  %v698_v3 = vrot.slane %v2795_v7, %v2595_v23  ;;  %v719_v48 = vsub.f32 %v2740_v21, %v694_v62  ;;  %v729_v4 = vmul.f32 1.442695, %v718_v63 }
 0x31f   :  { %2121 = vpow2.f32 %v725_v36  ;;  %v1235_v59 = vrot.slane %v2801_v44, %v2595_v23  ;;  %v1256_v42 = vsub.f32 %v2738_v20, %v1231_v54  ;;  %v1266_v46 = vmul.f32 1.442695, %v1255_v2 }
 0x320   :  { %2123 = vpow2.f32 %v1260_v1  ;;  %v702_v58 = vrot.slane %v2795_v7, %v2704_v30  ;;  %v720_v21 = vsub.f32 %v2746_v24, %v698_v3  ;;  %v731_v19 = vmul.f32 1.442695, %v719_v48 }
 0x321   :  { %2125 = vpow2.f32 %v1262_v57  ;;  %v1239_v27 = vrot.slane %v2801_v44, %v2704_v30  ;;  %v1257_v20 = vsub.f32 %v2744_v22, %v1235_v59  ;;  %v1268_v29 = vmul.f32 1.442695, %v1256_v42 }
 0x322   :  { %2127 = vpow2.f32 %v727_v43  ;;  %v706_v34 = vrot.slane %v2795_v7, %v2699_v28  ;;  %v721_v36 = vsub.f32 %v2732_v16, %v702_v58  ;;  %v733_v31 = vmul.f32 1.442695, %v720_v21 }
 0x323   :  { %2129 = vpow2.f32 %v1264_v50  ;;  %v1243_v24 = vrot.slane %v2801_v44, %v2699_v28  ;;  %v1258_v39 = vsub.f32 %v2734_v18, %v1239_v27  ;;  %v1270_v40 = vmul.f32 1.442695, %v1257_v20 }
 0x324   :  { %2131 = vpow2.f32 %v729_v4  ;;  %v722_v22 = vsub.f32 %v2750_v25, %v706_v34  ;;  %v735_v16 = vmul.f32 1.442695, %v721_v36 }
 0x325   :  { %2133 = vpow2.f32 %v1266_v46  ;;  %v1259_v55 = vsub.f32 %v2752_v26, %v1243_v24  ;;  %v1272_v44 = vmul.f32 1.442695, %v1258_v39 }
 0x326   :  { %2135 = vpow2.f32 %v731_v19  ;;  %v737_v18 = vmul.f32 1.442695, %v722_v22 }
 0x327   :  { %2137 = vpow2.f32 %v1268_v29  ;;  %v1274_v25 = vmul.f32 1.442695, %v1259_v55 }
 0x328   :  { %2139 = vpow2.f32 %v733_v31 }
 0x329   :  { %2141 = vpow2.f32 %v1270_v40 }
 0x32a   :  { %2143 = vpow2.f32 %v735_v16 }
 0x32b   :  { %v2830_v6 = vpop.eup %2119  ;;  %2145 = vpow2.f32 %v1272_v44 }
 0x32c   :  { %v2835_v15 = vpop.eup %2121  ;;  %748 = vperm.xlu0 %2100, %v2830_v6   ;;  %2147 = vpow2.f32 %v737_v18 }
 0x32d   :  { %751 = vperm.xlu1 %2101, %v2835_v15   ;;  %v2848_v33 = vpop.eup %2123  ;;  %2149 = vpow2.f32 %v1274_v25 }
 0x32e   :  { %v2853_v45 = vpop.eup %2125 }
 0x32f   :  { %v2858_v7 = vpop.eup %2127 }
 0x330   :  { %1288 = vperm.xlu0 %2100, %v2853_v45   ;;  %v2861_v47 = vpop.eup %2129 }
 0x331   :  { %1285 = vperm.xlu1 %2101, %v2848_v33   ;;  %v2865_v51 = vpop.eup %2131 }
 0x332   :  { %v2867_v52 = vpop.eup %2133 }
 0x333   :  { %v2871_v26 = vpop.eup %2135 }
 0x334   :  { %1291 = vperm.xlu0 %2100, %v2861_v47   ;;  %v2873_v35 = vpop.eup %2137 }
 0x335   :  { %754 = vperm.xlu1 %2101, %v2858_v7   ;;  %v2877_v1 = vpop.eup %2139 }
 0x336   :  { %v2879_v57 = vpop.eup %2141 }
 0x337   :  { %v2883_v62 = vpop.eup %2143 }
 0x338   :  { %1294 = vperm.xlu0 %2100, %v2867_v52   ;;  %v2885_v63 = vpop.eup %2145 }
 0x339   :  { %757 = vperm.xlu1 %2101, %v2865_v51   ;;  %v2889_v43 = vpop.eup %2147 }
 0x33a   :  { %v2891_v54 = vpop.eup %2149 }
 0x33c   :  { %1297 = vperm.xlu0 %2100, %v2873_v35  }
 0x33d   :  { %760 = vperm.xlu1 %2101, %v2871_v26  }
 0x340   :  { %1300 = vperm.xlu0 %2100, %v2879_v57  }
 0x341   :  { %763 = vperm.xlu1 %2101, %v2877_v1  }
 0x344   :  { %1303 = vperm.xlu0 %2100, %v2885_v63  }
 0x345   :  { %766 = vperm.xlu1 %2101, %v2883_v62  }
 0x348   :  { %1306 = vperm.xlu0 %2100, %v2891_v54  }
 0x349   :  { %769 = vperm.xlu1 %2101, %v2889_v43  }
 0x3a7   :  { %v749_v50 = vpop.permute.xlu0 %748 }
 0x3a8   :  { %v752_v2 = vpop.permute.xlu1 %751  ;;  %v774_v20 = vrot.slane %v749_v50, %v2761_v41 }
 0x3a9   :  { %v778_v27 = vrot.slane %v752_v2, %v2761_v41 }
 0x3ab   :  { %v1289_v48 = vpop.permute.xlu0 %1288  ;;  %v803_v55 = vsel %vm655_vm3, %v778_v27, %v774_v20 }
 0x3ac   :  { %v1286_v3 = vpop.permute.xlu1 %1285  ;;  %v1315_v36 = vrot.slane %v1289_v48, %v2761_v41 }
 0x3ad   :  { %v1311_v34 = vrot.slane %v1286_v3, %v2761_v41 }
 0x3af   :  { %v1292_v59 = vpop.permute.xlu0 %1291  ;;  %v1340_v2 = vsel %vm655_vm3, %v1315_v36, %v1311_v34 }
 0x3b0   :  { %v755_v4 = vpop.permute.xlu1 %754  ;;  %v1319_v24 = vrot.slane %v1292_v59, %v2761_v41 }
 0x3b1   :  { %v782_v31 = vrot.slane %v755_v4, %v2761_v41 }
 0x3b2   :  { %v1341_v4 = vsel %vm657_vm4, %v1319_v24, %v1340_v2 }
 0x3b3   :  { %v1295_v46 = vpop.permute.xlu0 %1294  ;;  %v804_v50 = vsel %vm657_vm4, %v782_v31, %v803_v55 }
 0x3b4   :  { %v758_v42 = vpop.permute.xlu1 %757  ;;  %v1323_v40 = vrot.slane %v1295_v46, %v2761_v41 }
 0x3b5   :  { %v786_v39 = vrot.slane %v758_v42, %v2761_v41 }
 0x3b6   :  { %v1342_v46 = vsel %vm659_vm5, %v1323_v40, %v1341_v4 }
 0x3b7   :  { %v1298_v21 = vpop.permute.xlu0 %1297  ;;  %v805_v59 = vsel %vm659_vm5, %v786_v39, %v804_v50 }
 0x3b8   :  { %v761_v58 = vpop.permute.xlu1 %760  ;;  %v1327_v44 = vrot.slane %v1298_v21, %v2761_v41 }
 0x3b9   :  { %v790_v22 = vrot.slane %v761_v58, %v2761_v41 }
 0x3bb   :  { %v1301_v29 = vpop.permute.xlu0 %1300  ;;  %v806_v58 = vsel %vm661_vm6, %v790_v22, %v805_v59 }
 0x3bc   :  { %v764_v19 = vpop.permute.xlu1 %763  ;;  %v1331_v3 = vrot.slane %v1301_v29, %v2761_v41 }
 0x3bd   :  { %v794_v18 = vrot.slane %v764_v19, %v2761_v41  ;;  %v1343_v19 = vsel %vm661_vm6, %v1327_v44, %v1342_v46 }
 0x3be   :  { %v1344_v34 = vsel %vm663_vm7, %v1331_v3, %v1343_v19 }
 0x3bf   :  { %v1304_v25 = vpop.permute.xlu0 %1303  ;;  %v807_v27 = vsel %vm663_vm7, %v794_v18, %v806_v58 }
 0x3c0   :  { %v767_v16 = vpop.permute.xlu1 %766  ;;  %v1335_v42 = vrot.slane %v1304_v25, %v2761_v41 }
 0x3c1   :  { %v798_v48 = vrot.slane %v767_v16, %v2761_v41 }
 0x3c2   :  { %v1345_v39 = vsel %vm665_vm8, %v1335_v42, %v1344_v34 }
 0x3c3   :  { %v1307_v29 = vpop.permute.xlu0 %1306  ;;  %v808_v31 = vsel %vm665_vm8, %v798_v48, %v807_v27 }
 0x3c4   :  { %v770_v21 = vpop.permute.xlu1 %769  ;;  %v1339_v36 = vrot.slane %v1307_v29, %v2761_v41 }
 0x3c5   :  { %v802_v20 = vrot.slane %v770_v21, %v2761_v41 }
 0x3c6   :  { %v1346_v22 = vsel %vm667_vm9, %v1339_v36, %v1345_v39 }
 0x3c7   :  { %v809_v24 = vsel %vm667_vm9, %v802_v20, %v808_v31  ;;  %v1348_v16 = vsel %vm670_vm10, %v1346_v22, 0.0 }
 0x3c8   :  { %v811_v40 = vsel %vm670_vm10, %v809_v24, 0.0  ;;  %1349 = vadd.xlane.f32.xlu0 %v1348_v16 }
 0x3c9   :  { %812 = vadd.xlane.f32.xlu1 %v811_v40 }
 0x451   :  { %v1350_v44 = vpop.xlane.xlu0 %1349 }
 0x452   :  { %v813_v55 = vpop.xlane.xlu1 %812 }
 0x453   :  { %2151 = vrcp.f32 %v813_v55 }
 0x454   :  { %2153 = vrcp.f32 %v1350_v44 }
 0x460   :  { %v2152_v18 = vpop.eup %2151 }
 0x461   :  { %v2154_v41 = vpop.eup %2153  ;;  %v823_v25 = vrot.slane %v2152_v18, %v2557_v10  ;;  %v827_v2 = vrot.slane %v2152_v18, %v2565_v12  ;;  %v831_v50 = vrot.slane %v2152_v18, %v2579_v17  ;;  %v819_v3 = vrot.slane %v2152_v18, %v2560_v11 }
 0x462   :  { %v1360_v48 = vrot.slane %v2154_v41, %v2557_v10  ;;  %v1364_v4 = vrot.slane %v2154_v41, %v2565_v12  ;;  %v1368_v59 = vrot.slane %v2154_v41, %v2579_v17  ;;  %v1356_v42 = vrot.slane %v2154_v41, %v2560_v11 }
 0x463   :  { %v857_v46 = vmul.f32 %v2835_v15, %v823_v25  ;;  %v858_v58 = vmul.f32 %v2858_v7, %v827_v2  ;;  %v859_v21 = vmul.f32 %v2865_v51, %v831_v50  ;;  %v856_v19 = vmul.f32 %v2830_v6, %v819_v3 }
 0x464   :  { %v1394_v27 = vmul.f32 %v2853_v45, %v1360_v48  ;;  %v1395_v20 = vmul.f32 %v2861_v47, %v1364_v4  ;;  %v1396_v29 = vmul.f32 %v2867_v52, %v1368_v59  ;;  %v1393_v34 = vmul.f32 %v2848_v33, %v1356_v42 }
 0x465   :  { %879 = vperm.xlu0 %2100, %v857_v46   ;;  %v1372_v36 = vrot.slane %v2154_v41, %v2574_v14  ;;  %v835_v31 = vrot.slane %v2152_v18, %v2574_v14  ;;  %v1376_v15 = vrot.slane %v2154_v41, %v2595_v23  ;;  %v839_v7 = vrot.slane %v2152_v18, %v2595_v23 }
 0x466   :  { %1416 = vperm.xlu1 %2101, %v1394_v27   ;;  %v2947_v51 = vadd.f32 %v1394_v27, %v857_v46  ;;  %v2949_v6 = vadd.f32 %v1395_v20, %v858_v58  ;;  %v2951_v45 = vadd.f32 %v1396_v29, %v859_v21  ;;  %v2953_v47 = vadd.f32 %v1393_v34, %v856_v19 }
 0x467   :  { %v1397_v33 = vmul.f32 %v2873_v35, %v1372_v36  ;;  %v860_v52 = vmul.f32 %v2871_v26, %v835_v31  ;;  %v1398_v24 = vmul.f32 %v2879_v57, %v1376_v15  ;;  %v861_v39 = vmul.f32 %v2877_v1, %v839_v7 }
 0x468   :  { %v1380_v40 = vrot.slane %v2154_v41, %v2704_v30  ;;  %v843_v22 = vrot.slane %v2152_v18, %v2704_v30  ;;  %v1384_v16 = vrot.slane %v2154_v41, %v2699_v28  ;;  %v847_v55 = vrot.slane %v2152_v18, %v2699_v28  ;;  %v2113_v18 = vld [vmem:[#allocation11 + $0x8] sm:$0xff]  }
 0x469   :  { %1421 = vperm.xlu0 %2100, %v1395_v20   ;;  %v2963_v44 = vadd.f32 %v1397_v33, %v860_v52  ;;  %v2965_v25 = vadd.f32 %v1398_v24, %v861_v39  ;;  %2053 = vmatpush3.bf16.msra.mxu0 %v2113_v18 }
 0x46a   :  { %884 = vperm.xlu1 %2101, %v858_v58   ;;  %v1399_v26 = vmul.f32 %v2885_v63, %v1380_v40  ;;  %v862_v35 = vmul.f32 %v2883_v62, %v843_v22  ;;  %v1400_v1 = vmul.f32 %v2891_v54, %v1384_v16  ;;  %v863_v57 = vmul.f32 %v2889_v43, %v847_v55  ;;  %v192_v62 = vld [vmem:[%s3118_s15] sm:$0x3]  ;;  %s2408_s15 = smov 96  }
 0x46b   :  { %v1516_v63 = vrot.slane %v192_v62, %v2557_v10  ;;  %v980_v43 = vrot.slane %v192_v62, %v2560_v11  ;;  %v2407_v54 = vmov 8   ;;  %2054 = vmatprep.subr.bf16.mxu0 %v2402_v0  ;;  %v2995_v55 = vmul.f32 0.5, %v2949_v6 }
 0x46c   :  { %v2971_v2 = vadd.f32 %v1399_v26, %v862_v35  ;;  %v2973_v50 = vadd.f32 %v1400_v1, %v863_v57  ;;  %v2999_v62 = vmul.f32 0.5, %v2965_v25 }
 0x46d   :  { %889 = vperm.xlu0 %2100, %v859_v21  }
 0x46e   :  { %874 = vperm.xlu1 %2101, %v856_v19   ;;  %v3004_v6 = vmul.f32 0.5, %v2973_v50 }
 0x471   :  { %1426 = vperm.xlu0 %2100, %v1396_v29  }
 0x472   :  { %1411 = vperm.xlu1 %2101, %v1393_v34  }
 0x475   :  { %1431 = vperm.xlu0 %2100, %v1397_v33  }
 0x476   :  { %894 = vperm.xlu1 %2101, %v860_v52  }
 0x479   :  { %1436 = vperm.xlu0 %2100, %v1398_v24  }
 0x47a   :  { %899 = vperm.xlu1 %2101, %v861_v39  }
 0x47d   :  { %1441 = vperm.xlu0 %2100, %v1399_v26  }
 0x47e   :  { %904 = vperm.xlu1 %2101, %v862_v35  }
 0x481   :  { %1446 = vperm.xlu0 %2100, %v1400_v1  }
 0x482   :  { %909 = vperm.xlu1 %2101, %v863_v57  }
 0x485   :  { %1518 = vrot.lane.b32.xlu0 %v1516_v63, %s2406_s7 }
 0x486   :  { %2102 = vset.pattern.permute.xlu0 %v2407_v54  ;;  %982 = vrot.lane.b32.xlu1 %v980_v43, %s2406_s7 }
 0x489   :  { %1653 = vperm.xlu0 %2102, %v2571_v13  }
 0x48d   :  { %2103 = vset.pattern.permute.xlu0 %v2405_v56 }
 0x4e0   :  { %v880_v41 = vpop.permute.xlu0 %879 }
 0x4e1   :  { %v1417_v3 = vpop.permute.xlu1 %1416  ;;  %v913_v48 = vmul.f32 %v880_v41, %v2634_v8 }
 0x4e2   :  { %v1450_v4 = vmul.f32 %v1417_v3, %v2634_v8 }
 0x4e3   :  { %v928_v59 = vsel %vm920_vm11, %v913_v48, 0.0 }
 0x4e4   :  { %v1464_v42 = vsel %vm920_vm11, %v1450_v4, 0.0  ;;  %v929_v46 = vrot.slane %v928_v59, 4  ;;  %v1422_v58 = vpop.permute.xlu0 %1421 }
 0x4e5   :  { %v1465_v13 = vrot.slane %v1464_v42, 4  ;;  %v885_v21 = vpop.permute.xlu1 %884  ;;  %v1451_v56 = vmul.f32 %v1422_v58, %v2625_v61 }
 0x4e6   :  { %v930_v19 = vadd.f32 %v929_v46, %v928_v59  ;;  %v914_v27 = vmul.f32 %v885_v21, %v2625_v61 }
 0x4e7   :  { %v1466_v20 = vadd.f32 %v1465_v13, %v1464_v42  ;;  %v1471_v29 = vsel %vm920_vm11, %v1451_v56, 0.0 }
 0x4e8   :  { %v931_v34 = vrot.slane %v930_v19, 2  ;;  %v935_v36 = vsel %vm920_vm11, %v914_v27, 0.0  ;;  %v1472_v8 = vrot.slane %v1471_v29, 4  ;;  %v890_v31 = vpop.permute.xlu0 %889 }
 0x4e9   :  { %v1467_v15 = vrot.slane %v1466_v20, 2  ;;  %v936_v7 = vrot.slane %v935_v36, 4  ;;  %v875_v33 = vpop.permute.xlu1 %874  ;;  %v915_v52 = vmul.f32 %v890_v31, %v2650_v32 }
 0x4ea   :  { %v932_v24 = vadd.f32 %v931_v34, %v930_v19  ;;  %v1473_v39 = vadd.f32 %v1472_v8, %v1471_v29  ;;  %v912_v40 = vmul.f32 %v875_v33, %v2618_v53 }
 0x4eb   :  { %v1468_v22 = vadd.f32 %v1467_v15, %v1466_v20  ;;  %v937_v16 = vadd.f32 %v936_v7, %v935_v36  ;;  %v942_v61 = vsel %vm920_vm11, %v915_v52, 0.0 }
 0x4ec   :  { %v1474_v26 = vrot.slane %v1473_v39, 2  ;;  %v921_v35 = vsel %vm920_vm11, %v912_v40, 0.0  ;;  %v943_v1 = vrot.slane %v942_v61, 4  ;;  %v1427_v57 = vpop.permute.xlu0 %1426  ;;  %v933_v63 = vrot.slane %v932_v24, 1 }
 0x4ed   :  { %v938_v43 = vrot.slane %v937_v16, 2  ;;  %v922_v54 = vrot.slane %v921_v35, 4  ;;  %v1412_v18 = vpop.permute.xlu1 %1411  ;;  %v1452_v41 = vmul.f32 %v1427_v57, %v2650_v32  ;;  %v1469_v59 = vrot.slane %v1468_v22, 1 }
 0x4ee   :  { %v1475_v3 = vadd.f32 %v1474_v26, %v1473_v39  ;;  %v944_v48 = vadd.f32 %v943_v1, %v942_v61  ;;  %v1449_v4 = vmul.f32 %v1412_v18, %v2618_v53  ;;  %v3008_v27 = vadd.f32 %v933_v63, %v932_v24 }
 0x4ef   :  { %v939_v42 = vadd.f32 %v938_v43, %v937_v16  ;;  %v923_v46 = vadd.f32 %v922_v54, %v921_v35  ;;  %v1478_v58 = vsel %vm920_vm11, %v1452_v41, 0.0  ;;  %v3012_v31 = vadd.f32 %v1469_v59, %v1468_v22 }
 0x4f0   :  { %v1476_v25 = vrot.slane %v1475_v3, 1  ;;  %v945_v13 = vrot.slane %v944_v48, 2  ;;  %v1457_v21 = vsel %vm920_vm11, %v1449_v4, 0.0  ;;  %v1479_v56 = vrot.slane %v1478_v58, 4  ;;  %v1432_v19 = vpop.permute.xlu0 %1431 }
 0x4f1   :  { %v924_v32 = vrot.slane %v923_v46, 2  ;;  %v1458_v20 = vrot.slane %v1457_v21, 4  ;;  %v895_v29 = vpop.permute.xlu1 %894  ;;  %v1453_v53 = vmul.f32 %v1432_v19, %v2664_v49  ;;  %v940_v50 = vrot.slane %v939_v42, 1 }
 0x4f2   :  { %v946_v34 = vadd.f32 %v945_v13, %v944_v48  ;;  %v1480_v36 = vadd.f32 %v1479_v56, %v1478_v58  ;;  %v916_v8 = vmul.f32 %v895_v29, %v2664_v49  ;;  %v3015_v52 = vadd.f32 %v1476_v25, %v1475_v3 }
 0x4f3   :  { %v925_v15 = vadd.f32 %v924_v32, %v923_v46  ;;  %v1459_v7 = vadd.f32 %v1458_v20, %v1457_v21  ;;  %v1485_v33 = vsel %vm920_vm11, %v1453_v53, 0.0  ;;  %v3019_v49 = vadd.f32 %v940_v50, %v939_v42 }
 0x4f4   :  { %v1481_v24 = vrot.slane %v1480_v36, 2  ;;  %v949_v39 = vsel %vm920_vm11, %v916_v8, 0.0  ;;  %v1486_v40 = vrot.slane %v1485_v33, 4  ;;  %v1437_v16 = vpop.permute.xlu0 %1436  ;;  %v947_v61 = vrot.slane %v946_v34, 1 }
 0x4f5   :  { %v1460_v26 = vrot.slane %v1459_v7, 2  ;;  %v950_v35 = vrot.slane %v949_v39, 4  ;;  %v900_v1 = vpop.permute.xlu1 %899  ;;  %v1454_v57 = vmul.f32 %v1437_v16, %v2684_v9  ;;  %v926_v54 = vrot.slane %v925_v15, 1 }
 0x4f6   :  { %v1482_v22 = vadd.f32 %v1481_v24, %v1480_v36  ;;  %v1487_v63 = vadd.f32 %v1486_v40, %v1485_v33  ;;  %v917_v43 = vmul.f32 %v900_v1, %v2684_v9  ;;  %v948_v25 = vadd.f32 %v947_v61, %v946_v34 }
 0x4f7   :  { %v1461_v18 = vadd.f32 %v1460_v26, %v1459_v7  ;;  %v951_v41 = vadd.f32 %v950_v35, %v949_v39  ;;  %v1492_v3 = vsel %vm920_vm11, %v1454_v57, 0.0  ;;  %v927_v29 = vadd.f32 %v926_v54, %v925_v15 }
 0x4f8   :  { %v1483_v48 = vrot.slane %v1482_v22, 1  ;;  %v1488_v4 = vrot.slane %v1487_v63, 2  ;;  %v956_v59 = vsel %vm920_vm11, %v917_v43, 0.0  ;;  %v1493_v46 = vrot.slane %v1492_v3, 4  ;;  %v1442_v58 = vpop.permute.xlu0 %1441 }
 0x4f9   :  { %v952_v13 = vrot.slane %v951_v41, 2  ;;  %v957_v21 = vrot.slane %v956_v59, 4  ;;  %v905_v42 = vpop.permute.xlu1 %904  ;;  %v1455_v56 = vmul.f32 %v1442_v58, %v2653_v38  ;;  %v1462_v19 = vrot.slane %v1461_v18, 1 }
 0x4fa   :  { %v1489_v32 = vadd.f32 %v1488_v4, %v1487_v63  ;;  %v1494_v9 = vadd.f32 %v1493_v46, %v1492_v3  ;;  %v918_v20 = vmul.f32 %v905_v42, %v2653_v38  ;;  %v1484_v8 = vadd.f32 %v1483_v48, %v1482_v22 }
 0x4fb   :  { %v953_v53 = vadd.f32 %v952_v13, %v951_v41  ;;  %v958_v50 = vadd.f32 %v957_v21, %v956_v59  ;;  %v1499_v36 = vsel %vm920_vm11, %v1455_v56, 0.0  ;;  %v1463_v35 = vadd.f32 %v1462_v19, %v1461_v18 }
 0x4fc   :  { %v1495_v7 = vrot.slane %v1494_v9, 2  ;;  %v963_v33 = vsel %vm920_vm11, %v918_v20, 0.0  ;;  %v1500_v34 = vrot.slane %v1499_v36, 4  ;;  %v1447_v24 = vpop.permute.xlu0 %1446  ;;  %v1490_v39 = vrot.slane %v1489_v32, 1 }
 0x4fd   :  { %v959_v40 = vrot.slane %v958_v50, 2  ;;  %v964_v16 = vrot.slane %v963_v33, 4  ;;  %v910_v61 = vpop.permute.xlu1 %909  ;;  %v1456_v26 = vmul.f32 %v1447_v24, %v2675_v60  ;;  %v954_v57 = vrot.slane %v953_v53, 1 }
 0x4fe   :  { %v1496_v1 = vadd.f32 %v1495_v7, %v1494_v9  ;;  %v1501_v38 = vadd.f32 %v1500_v34, %v1499_v36  ;;  %v919_v15 = vmul.f32 %v910_v61, %v2675_v60  ;;  %v1491_v59 = vadd.f32 %v1490_v39, %v1489_v32 }
 0x4ff   :  { %v960_v63 = vadd.f32 %v959_v40, %v958_v50  ;;  %v965_v43 = vadd.f32 %v964_v16, %v963_v33  ;;  %v1506_v22 = vsel %vm920_vm11, %v1456_v26, 0.0  ;;  %v955_v19 = vadd.f32 %v954_v57, %v953_v53 }
 0x500   :  { %v1497_v54 = vrot.slane %v1496_v1, 1  ;;  %v1502_v41 = vrot.slane %v1501_v38, 2  ;;  %v970_v3 = vsel %vm920_vm11, %v919_v15, 0.0  ;;  %v1507_v48 = vrot.slane %v1506_v22, 4  ;;  %v1519_v4 = vpop.permute.xlu0 %1518  ;;  %v2114_v15 = vld [vmem:[#allocation11] sm:$0xff]  }
 0x501   :  { %v961_v46 = vrot.slane %v960_v63, 1  ;;  %v966_v58 = vrot.slane %v965_v43, 2  ;;  %v971_v13 = vrot.slane %v970_v3, 4  ;;  %v983_v18 = vpop.permute.xlu1 %982  ;;  %v1521_v60 = vmul.f32 %v1519_v4, %v1463_v35  ;;  %2055 = vmatpush3.bf16.msra.mxu0 %v2114_v15 }
 0x502   :  { %v1503_v21 = vadd.f32 %v1502_v41, %v1501_v38  ;;  %v1508_v42 = vadd.f32 %v1507_v48, %v1506_v22  ;;  %v985_v56 = vmul.f32 %v983_v18, %v927_v29  ;;  %v986_v50 = vmul.f32 %v983_v18, %v3008_v27  ;;  %2060 = vmatprep.subr.bf16.mxu0 %v2402_v0 }
 0x503   :  { %v967_v9 = vadd.f32 %v966_v58, %v965_v43  ;;  %v972_v20 = vadd.f32 %v971_v13, %v970_v3  ;;  %v962_v36 = vadd.f32 %v961_v46, %v960_v63  ;;  %v1498_v7 = vadd.f32 %v1497_v54, %v1496_v1 }
 0x504   :  { %v1504_v33 = vrot.slane %v1503_v21, 1  ;;  %v1509_v34 = vrot.slane %v1508_v42, 2  ;;  %v3033_v24 = vpop.permute.xlu0 %1653  ;;  %v987_v40 = vmul.f32 %v983_v18, %v3019_v49  ;;  %v1522_v16 = vmul.f32 %v1519_v4, %v3012_v31 }
 0x505   :  { %v968_v32 = vrot.slane %v967_v9, 1  ;;  %v973_v39 = vrot.slane %v972_v20, 2  ;;  %v988_v29 = vmul.f32 %v983_v18, %v948_v25  ;;  %v1523_v53 = vmul.f32 %v1519_v4, %v3015_v52 }
 0x506   :  { %v1510_v61 = vadd.f32 %v1509_v34, %v1508_v42  ;;  %v1529_v26 = vadd.f32 %v1521_v60, %v985_v56  ;;  %v1530_v27 = vadd.f32 %v1522_v16, %v986_v50  ;;  %v1668_v1 = vrot.slane %v3033_v24, %v2565_v12 }
 0x507   :  { %v969_v35 = vadd.f32 %v968_v32, %v967_v9  ;;  %v974_v38 = vadd.f32 %v973_v39, %v972_v20  ;;  %v1505_v57 = vadd.f32 %v1504_v33, %v1503_v21  ;;  %v1524_v43 = vmul.f32 %v1519_v4, %v1484_v8 }
 0x508   :  { %v1511_v63 = vrot.slane %v1510_v61, 1  ;;  %v1545_v22 = vpack.c.bf16 %v1529_v26, %v1529_v26  ;;  %v1699_v49 = vmul.f32 %v1668_v1, %v2995_v55  ;;  %v1680_v31 = vrot.slane %v3033_v24, %v2595_v23 }
 0x509   :  { %v975_v54 = vrot.slane %v974_v38, 1  ;;  %v989_v25 = vmul.f32 %v983_v18, %v955_v19  ;;  %v1546_v41 = vpack.c.bf16 %v1530_v27, %v1530_v27  ;;  %v1688_v3 = vrot.slane %v3033_v24, %v2699_v28 }
 0x50a   :  { %v1512_v52 = vadd.f32 %v1511_v63, %v1510_v61  ;;  %v990_v48 = vmul.f32 %v983_v18, %v962_v36  ;;  %1899 = vperm.xlu0 %2103, %v1699_v49   ;;  %v991_v8 = vmul.f32 %v983_v18, %v969_v35  ;;  %v1525_v46 = vmul.f32 %v1519_v4, %v1491_v59 }
 0x50b   :  { %v976_v12 = vadd.f32 %v975_v54, %v974_v38  ;;  %v1526_v58 = vmul.f32 %v1519_v4, %v1498_v7  ;;  %v1527_v13 = vmul.f32 %v1519_v4, %v1505_v57  ;;  %v1531_v21 = vadd.f32 %v1523_v53, %v987_v40 }
 0x50c   :  { %v1528_v55 = vmul.f32 %v1519_v4, %v1512_v52  ;;  %v1532_v42 = vadd.f32 %v1524_v43, %v988_v29  ;;  %v1702_v23 = vmul.f32 %v1680_v31, %v2999_v62  ;;  %v1533_v60 = vadd.f32 %v1525_v46, %v989_v25 }
 0x50d   :  { %v992_v56 = vmul.f32 %v983_v18, %v976_v12  ;;  %v1534_v19 = vadd.f32 %v1526_v58, %v990_v48  ;;  %v1535_v9 = vadd.f32 %v1527_v13, %v991_v8  ;;  %v1547_v20 = vpack.c.bf16 %v1531_v21, %v1531_v21 }
 0x50e   :  { %v1548_v28 = vpack.c.bf16 %v1532_v42, %v1532_v42  ;;  %v1573_v50 = vunpack.c.l.b16 %v1546_v41  ;;  %1908 = vperm.xlu0 %2103, %v1702_v23   ;;  %v1549_v33 = vpack.c.bf16 %v1533_v60, %v1533_v60  ;;  %v1572_v32 = vunpack.c.l.b16 %v1545_v22 }
 0x50f   :  { %v1536_v36 = vadd.f32 %v1528_v55, %v992_v56  ;;  %v1550_v34 = vpack.c.bf16 %v1534_v19, %v1534_v19  ;;  %v1551_v59 = vpack.c.bf16 %v1535_v9, %v1535_v9  ;;  %v1574_v7 = vunpack.c.l.b16 %v1547_v20 }
 0x510   :  { %v1575_v39 = vunpack.c.l.b16 %v1548_v28  ;;  %v1580_v4 = vrot.slane %v1573_v50, 7  ;;  %v1704_v40 = vmul.f32 %v1688_v3, %v3004_v6  ;;  %v1576_v62 = vunpack.c.l.b16 %v1549_v33 }
 0x511   :  { %v1552_v16 = vpack.c.bf16 %v1536_v36, %v1536_v36  ;;  %v1577_v18 = vunpack.c.l.b16 %v1550_v34  ;;  %v1578_v61 = vunpack.c.l.b16 %v1551_v59  ;;  %v1582_v53 = vrot.slane %v1574_v7, 6  ;;  %v2118_v36 = vld [vmem:[#allocation17] sm:$0xff]   ;;  %v2006_v34 = vld [vmem:[#allocation16] ss:$0 sm:$0xff] }
 0x512   :  { %v1581_v29 = vsel %vm655_vm3, %v1580_v4, %v1572_v32  ;;  %1914 = vperm.xlu0 %2103, %v1704_v40   ;;  %v1584_v35 = vrot.slane %v1575_v39, 5  ;;  %v1586_v1 = vrot.slane %v1576_v62, 4  ;;  %v1660_v31 = vrot.slane %v3033_v24, %v2560_v11 }
 0x513   :  { %v1579_v26 = vunpack.c.l.b16 %v1552_v16  ;;  %v1588_v38 = vrot.slane %v1577_v18, 3  ;;  %v1583_v27 = vsel %vm657_vm4, %v1582_v53, %v1581_v29  ;;  %v1590_v15 = vrot.slane %v1578_v61, 2 }
 0x514   :  { %v1585_v57 = vsel %vm659_vm5, %v1584_v35, %v1583_v27  ;;  %v1537_v25 = vmul.f32 0.5, %v2953_v47  ;;  %v1664_v41 = vrot.slane %v3033_v24, %v2557_v10  ;;  %v1538_v3 = vmul.f32 0.5, %v2947_v51 }
 0x515   :  { %v1592_v63 = vrot.slane %v1579_v26, 1  ;;  %v1587_v6 = vsel %vm661_vm6, %v1586_v1, %v1585_v57  ;;  %v1672_v12 = vrot.slane %v3033_v24, %v2579_v17  ;;  %v1540_v8 = vmul.f32 0.5, %v2951_v45  ;;  %v2115_v17 = vld [vmem:[%s3112_s9 + $0x8] sm:$0xff]  }
 0x516   :  { %v1589_v43 = vsel %vm663_vm7, %v1588_v38, %v1587_v6  ;;  %v1697_v52 = vmul.f32 %v1660_v31, %v1537_v25  ;;  %v1698_v48 = vmul.f32 %v1664_v41, %v1538_v3  ;;  %v1676_v11 = vrot.slane %v3033_v24, %v2574_v14  ;;  %2067 = vmatpush3.bf16.msra.mxu1 %v2115_v17  ;;  %v2117_v14 = vld [vmem:[%s3112_s9] sm:$0xff]   ;;  %v2116_v45 = vld [vmem:[#allocation14] sm:$0xff]  }
 0x517   :  { %v1591_v22 = vsel %vm665_vm8, %v1590_v15, %v1589_v43  ;;  %v1700_v46 = vmul.f32 %v1672_v12, %v1540_v8  ;;  %v1541_v47 = vmul.f32 0.5, %v2963_v44  ;;  %v1684_v10 = vrot.slane %v3033_v24, %v2704_v30  ;;  %2068 = vmatprep.subr.bf16.mxu1 %v2402_v0  ;;  %v2155_v30 = vld [vmem:[#allocation2] sm:$0xf] }
 0x518   :  { %v1593_v54 = vsel %vm667_vm9, %v1592_v63, %v1591_v22  ;;  %v1543_v51 = vmul.f32 0.5, %v2971_v2  ;;  %v1997_v2 = vld [vmem:[#allocation13] ss:$0 sm:$0xff]  ;;  %v1916_v62 = vadd.s32 4294967280, %v2757_v37  ;;  %v2007_v31 = vld [vmem:[%s3116_s13] ss:$0 sm:$0xff] }
 0x519   :  { %v1594_v49 = vpack.c.b16 %v1593_v54, %v1593_v54  ;;  %v1701_v58 = vmul.f32 %v1676_v11, %v1541_v47 }
 0x51a   :  { %v1703_v13 = vmul.f32 %v1684_v10, %v1543_v51  ;;  %2069 = vmatpush3.bf16.msra.mxu1 %v2117_v14  ;;  %v1919_v61 = vsub.s32 %v1916_v62, %v2547_v5 }
 0x51b   :  { %1595 = vrot.lane.b32.xlu1 %v1594_v49, %s2408_s15 }
 0x51f   :  { %1893 = vperm.xlu1 %2101, %v1697_v52  }
 0x523   :  { %1896 = vperm.xlu1 %2101, %v1698_v48  }
 0x527   :  { %1902 = vperm.xlu1 %2101, %v1700_v46  }
 0x52b   :  { %1905 = vperm.xlu1 %2101, %v1701_v58  }
 0x52f   :  { %1911 = vperm.xlu1 %2101, %v1703_v13  }
 0x585   :  { %v1900_v29 = vpop.permute.xlu0 %1899 }
 0x586   :  { %v1928_v1 = vrot.slane %v1900_v29, %v1919_v61 }
 0x589   :  { %v1909_v15 = vpop.permute.xlu0 %1908 }
 0x58a   :  { %v1940_v54 = vrot.slane %v1909_v15, %v1919_v61 }
 0x58d   :  { %v1596_v44 = vpop.permute.xlu1 %1595  ;;  %v1915_v5 = vpop.permute.xlu0 %1914 }
 0x58e   :  { %2057 = vmatmul.mubr.msk.bf16.vlgmr.msra.gmra.mxu0 %vm216_vm1, %v1596_v44  ;;  %v1948_v52 = vrot.slane %v1915_v5, %v1919_v61 }
 0x58f   :  { %2061 = vmatpush3.bf16.msra.mxu0 %v2116_v45  ;;  %2062 = vmatprep.mubr.msk.bf16.mxu0 %vm2403_vm0, %v2402_v0 }
 0x590   :  { %2074 = vmatprep.subr.bf16.mxu0 %v2402_v0 }
 0x596   :  { %2063 = vmatmul.mubr.msk.bf16.vlgmr.msra.gmra.mxu0 %vm1718_vm12, %v2155_v30 }
 0x597   :  { %2076 = vmatprep.mubr.msk.bf16.mxu0 %vm2403_vm0, %v2402_v0  ;;  %2075 = vmatpush3.bf16.msra.mxu0 %v2118_v36 }
 0x59a   :  { %v1894_v40 = vpop.permute.xlu1 %1893 }
 0x59b   :  { %v1920_v35 = vrot.slane %v1894_v40, %v1919_v61 }
 0x59e   :  { %v1897_v16 = vpop.permute.xlu1 %1896 }
 0x59f   :  { %v1924_v53 = vrot.slane %v1897_v16, %v1919_v61 }
 0x5a1   :  { %v1949_v38 = vsel %vm655_vm3, %v1924_v53, %v1920_v35 }
 0x5a2   :  { %v1903_v18 = vpop.permute.xlu1 %1902  ;;  %v1950_v6 = vsel %vm657_vm4, %v1928_v1, %v1949_v38 }
 0x5a3   :  { %v1932_v27 = vrot.slane %v1903_v18, %v1919_v61 }
 0x5a5   :  { %v1951_v43 = vsel %vm659_vm5, %v1932_v27, %v1950_v6 }
 0x5a6   :  { %v1906_v26 = vpop.permute.xlu1 %1905 }
 0x5a7   :  { %v1936_v57 = vrot.slane %v1906_v26, %v1919_v61 }
 0x5a9   :  { %v1952_v37 = vsel %vm661_vm6, %v1936_v57, %v1951_v43 }
 0x5aa   :  { %v1912_v63 = vpop.permute.xlu1 %1911  ;;  %v1953_v49 = vsel %vm663_vm7, %v1940_v54, %v1952_v37 }
 0x5ab   :  { %v1944_v22 = vrot.slane %v1912_v63, %v1919_v61 }
 0x5ad   :  { %v1954_v25 = vsel %vm665_vm8, %v1944_v22, %v1953_v49 }
 0x5ae   :  { %v1955_v12 = vsel %vm667_vm9, %v1948_v52, %v1954_v25 }
 0x64e   :  { %v1646_v55 = vpop.f32.mrf.mxu0 }
 0x64f   :  { %v1647_v21 = vadd.f32 %v1997_v2, %v1646_v55 }
 0x650   :  { %v2058_v42 = vpop.f32.mrf.mxu0 }
 0x651   :  { %v1656_v23 = vmul.f32 %v3033_v24, %v1647_v21 }
 0x652   :  { %v1649_v56 = vpop.f32.mrf.mxu0 }
 0x653   :  { %v1705_v60 = vpack.c.bf16 %v1656_v23, %v1656_v23 }
 0x654   :  { %v2059_v19 = vpop.f32.mrf.mxu0 }
 0x655   :  { %2071 = vmatmul.mubr.msk.bf16.vlgmr.msra.gmra.mxu1 %vm216_vm1, %v1705_v60 }
 0x656   :  { %v1755_v9 = vpop.f32.mrf.mxu0 }
 0x658   :  { %v2064_v20 = vpop.f32.mrf.mxu0 }
 0x65a   :  { %v1758_v28 = vpop.f32.mrf.mxu0 }
 0x65c   :  { %v2065_v50 = vpop.f32.mrf.mxu0 }
 0x715   :  { %v1810_v33 = vpop.f32.mrf.mxu1 }
 0x716   :  { %v1811_v0 = vadd.f32 %v1810_v33, %v1755_v9 }
 0x717   :  { %v2072_v32 = vpop.f32.mrf.mxu1 }
 0x718   :  { %v1823_v59 = vadd.f32 %v2006_v34, %v1811_v0 }
 0x719   :  { %v1813_v7 = vpop.f32.mrf.mxu1 }
 0x71a   :  { %v1824_v39 = vmax.f32 %v1823_v59, 0.0 }
 0x71b   :  { %v2073_v4 = vpop.f32.mrf.mxu1 }
 0x71c   :  { %v1825_v24 = vpack.c.bf16 %v1824_v39, %v1824_v39 }
 0x71e   :  { %2077 = vmatmul.mubr.msk.bf16.vlgmr.msra.gmra.mxu0 %vm1718_vm12, %v1825_v24 }
 0x7de   :  { %v1878_v41 = vpop.f32.mrf.mxu0 }
 0x7df   :  { %v1879_v3 = vadd.f32 %v2007_v31, %v1878_v41 }
 0x7e0   :  { %v2078_v48 = vpop.f32.mrf.mxu0 }
 0x7e1   :  { %v1957_v8 = vsel %vm1718_vm12, %v1879_v3, %v1955_v12 }
 0x7e2   :  { %v1881_v46 = vpop.f32.mrf.mxu0  ;;  %v1959_v11 = vsel %vm1958_vm13, %v1957_v8, 0.0 }
 0x7e3   :  { %1960 = vst [vmem:[#allocation19] sm:$0xff] %v1959_v11 }
 0x7e4   :  { %v2079_v47 = vpop.f32.mrf.mxu0 }
 0x7e5   :  { %2367 = shalt.err (!%p2364_p12)
}
 0x7e6   :  { %1970 = dma.vmem_to_hbm [thread:$0]  %s1968_s6, 128, %s3119_s16, [#allocation4]  }
 0x7e7   :  { %2388 = dma.done.wait [#allocation4], 128  }
 0x7e8   :  { %2389 = vsyncadd [#allocation4], 4294967168 }
 0x7e9   :  { %1974 = vsyncpa [#allocation3], 1 }
 0x7ea   :  { %1975 = vsyncpa [#allocation6], 1 }
 0x7eb   :  { %1976 = vsyncpa [#allocation9], 1 }
 0x7ec   :  { %1977 = vsyncpa [#allocation12], 1 }
 0x7ed   :  { %1978 = vsyncpa [#allocation15], 1 }
 0x7ee   :  { %1979 = vsyncpa [#allocation18], 1 }
 0x7ef   :  { %1980 = vsyncpa [#allocation4], 1 }

</bundles_post_ra>
